<compile_context>
chip_gen: v5e
topology: v5e:2x2
jax: 0.10.0
libtpu: 0.0.40
codegen_flags: <defaults>
</compile_context>

<pallas_src>
import jax
import jax.numpy as jnp
import numpy as np
from jax.experimental import pallas as pl
from jax.experimental.pallas import tpu as pltpu

# ---------------------------------------------------------------------------
# Small, structurally faithful sizes
# ---------------------------------------------------------------------------
B = 2
C_IN = 4
H = W = 16
C_MID = 32
N_ATTR = 102            # 3DMM parameter length (fixed by the torch module)
N_ATTR_PAD = 128        # lane-padded attribute width used inside the kernel
N_SHP = 40
N_EXP = 10
N_ALPHA = N_SHP + N_EXP  # 50
NUM_VERTS = 1024        # torch hard-codes 53215; scaled down for the demo
N3 = 3 * NUM_VERTS

# In-kernel (permuted) attribute layout:
#   [ alpha_shp(40) | alpha_exp(10) | pose(12) | remaining(40) | zero pad(26) ]
POSE0_LO, POSE0_HI = N_ALPHA + 0, N_ALPHA + 3     # original columns 0..2
POSE1_LO, POSE1_HI = N_ALPHA + 4, N_ALPHA + 7     # original columns 4..6


# ---------------------------------------------------------------------------
# Fused kernel
#   grid = (n_outer["parallel"], n_inner["arbitrary"])
#   head (stem -> pool -> FC -> whitening -> pose scale) runs once per core
#   (inner == 0) into persistent VMEM scratch; every grid step then only
#   streams one int8 basis tile + one bf16 u tile and does the MXU matmul.
# ---------------------------------------------------------------------------
def igm_fused_kernel(x_ref, pool_ref, wc_ref, bc_ref, wh_ref, bh_ref,
                     std_ref, mean_ref, rs_ref, wq_ref, u_ref, o_ref,
                     alpha_sc, s_sc):
    @pl.when(pl.program_id(1) == 0)
    def _():
        # --- backbone stem: 1x1 conv as channels matmul + ReLU6 -------------
        feat = jnp.dot(x_ref[...], wc_ref[...],
                       preferred_element_type=jnp.float32)
        feat = jnp.clip(feat + bc_ref[...], 0.0, 6.0)            # (B*HW, Cmid)

        # --- global average pool: block-diagonal averaging matmul (MXU) -----
        pooled = jnp.dot(pool_ref[...], feat,
                         preferred_element_type=jnp.float32)     # (B, Cmid)

        # --- FC head (128-lane padded, permuted attribute layout) -----------
        attr = jnp.dot(pooled, wh_ref[...],
                       preferred_element_type=jnp.float32) + bh_ref[...]

        # --- whitening + pose scale s = (||row0|| + ||row1||)/2 (p_to_Rs) ----
        pw = attr * std_ref[...] + mean_ref[...]                 # (B, 128)
        col = jax.lax.broadcasted_iota(jnp.int32, pw.shape, 1)
        p2 = pw * pw
        n0 = jnp.sqrt(jnp.sum(
            jnp.where((col >= POSE0_LO) & (col < POSE0_HI), p2, 0.0),
            axis=-1, keepdims=True))
        n1 = jnp.sqrt(jnp.sum(
            jnp.where((col >= POSE1_LO) & (col < POSE1_HI), p2, 0.0),
            axis=-1, keepdims=True))
        s = (n0 + n1) * 0.5                                      # (B, 1)
        s_sc[...] = s
        # fold the int8 per-row dequant scales AND s into alpha (exact, f32)
        alpha_sc[...] = pw[:, 0:N_ALPHA] * rs_ref[...] * s       # (B, 50)

    # --- hot path: stream int8 basis tile, dequant on-chip, MXU matmul -------
    #   out = (s * alpha * row_scale) @ q + s * u
    w_tile = wq_ref[...].astype(jnp.float32)                     # exact dequant
    acc = jnp.dot(alpha_sc[...], w_tile,
                  preferred_element_type=jnp.float32)            # (B, tn)
    o_ref[...] = acc + s_sc[...] * u_ref[...].astype(jnp.float32)


# ---------------------------------------------------------------------------
# Tiling plan / VMEM budget
# ---------------------------------------------------------------------------
def _round_up(a, m):
    return (a + m - 1) // m * m


def _num_tensorcores():
    """2 TensorCores per device on megacore/dual-TC chips (v4 / v5p / v7x),
    1 on v5e / v6e."""
    try:
        kind = jax.devices()[0].device_kind.lower()
    except Exception:
        return 1
    return 2 if any(t in kind for t in ("v4", "v5p", "v7", "tpu7")) else 1


def _plan_vertex_tiling(n3, target_tn=8192, num_cores=None):
    """Pick the vertex lane tile so the int8 basis tile (~50*tn bytes) is
    comfortably double-buffered and the inner grid has enough steps for
    DMA/compute pipelining. Outer grid axis = one entry per TensorCore."""
    if num_cores is None:
        num_cores = _num_tensorcores()
    n_tiles = max(num_cores, pl.cdiv(n3, target_tn))
    n_tiles = _round_up(n_tiles, num_cores)
    tn = _round_up(pl.cdiv(n3, n_tiles), 128)
    n3_pad = n_tiles * tn
    return (tn, num_cores, n_tiles // num_cores, n3_pad, n3)


def _vmem_budget(bb, nhw, cin, cmid, nattr_p, tn):
    """Explicit scoped-VMEM budget from the chosen tile (double-buffered lane
    streams + on-chip dequant temp + small constant inputs + headroom),
    clamped to be safe on every generation (v7x has 64 MiB/core physical)."""
    per_tile = N_ALPHA * tn * 1 + tn * 2 + bb * tn * 4   # wq(i8) + u(bf16) + out(f32)
    dequant = N_ALPHA * tn * 4                            # f32 dequant temporary
    small = 4 * (nhw * cin + bb * nhw + cin * cmid + cmid
                 + 4 * nattr_p + cmid * nattr_p + bb * nattr_p + N_ALPHA)
    need = 2 * per_tile + dequant + 2 * small + (2 << 20)
    return int(min(max(need, 16 << 20), 28 << 20))


# ---------------------------------------------------------------------------
# Wrapper
# ---------------------------------------------------------------------------
def igm_forward(x, params, plan):
    tn, n_outer, n_inner, n3_pad, n3 = plan
    (pool_mat, wc, bc, wh_p, bh_p, std_p, mean_p,
     row_scale, wq, u_bf16) = params
    bb, cin, h, w = x.shape
    nhw = bb * h * w
    cmid = wc.shape[1]
    nattr_p = wh_p.shape[1]

    # NCHW -> NHWC -> (B*H*W, Cin): channels-last matmul layout for the stem.
    x_flat = jnp.transpose(x, (0, 2, 3, 1)).reshape(nhw, cin)

    cst = lambda i, j: (0, 0)                      # constant (fetched once)
    lane = lambda i, j: (0, i * n_inner + j)       # lane tile index

    out_flat = pl.pallas_call(
        igm_fused_kernel,
        out_shape=jax.ShapeDtypeStruct((bb, n3_pad), jnp.float32),
        grid=(n_outer, n_inner),
        in_specs=[
            pl.BlockSpec((nhw, cin), cst),          # x_flat
            pl.BlockSpec((bb, nhw), cst),           # block-diag pooling matrix
            pl.BlockSpec((cin, cmid), cst),         # stem weight
            pl.BlockSpec((1, cmid), cst),           # stem bias
            pl.BlockSpec((cmid, nattr_p), cst),     # head weight (perm+pad 128)
            pl.BlockSpec((1, nattr_p), cst),        # head bias
            pl.BlockSpec((1, nattr_p), cst),        # param_std
            pl.BlockSpec((1, nattr_p), cst),        # param_mean
            pl.BlockSpec((1, N_ALPHA), cst),        # int8 per-row dequant scales
            pl.BlockSpec((N_ALPHA, tn), lane),      # wT quantized int8 (planar)
            pl.BlockSpec((1, tn), lane),            # u bf16 (planar)
        ],
        out_specs=pl.BlockSpec((bb, tn), lane),
        scratch_shapes=[pltpu.VMEM((bb, N_ALPHA), jnp.float32),  # folded alpha
                        pltpu.VMEM((bb, 1), jnp.float32)],       # pose scale s
        compiler_params=pltpu.CompilerParams(
            dimension_semantics=("parallel", "arbitrary"),
            vmem_limit_bytes=_vmem_budget(bb, nhw, cin, cmid, nattr_p, tn)),
    )(x_flat, pool_mat, wc, bc, wh_p, bh_p, std_p, mean_p,
      row_scale, wq, u_bf16)

    # Output columns are planar [x... | y... | z...] (+ zero pad), so torch's
    # .view(-1, NV, 3).transpose(1, 2) becomes a slice + free reshape.
    return out_flat[:, :n3].reshape(bb, 3, n3 // 3)


# ---------------------------------------------------------------------------
# One-time host-side parameter preparation (layout folding + quantization)
# ---------------------------------------------------------------------------
def _prepare_params(Wc, bc, Wh, bh, param_std, param_mean, w_shp, w_exp, u,
                    n3_pad):
    """Fold the checkpoint buffers into kernel-friendly layouts:
      * attribute axis permuted to [alpha(50) | pose(12) | rest(40)], padded
        to 128 lanes (applied consistently to Wh, bh, std, mean),
      * wT = [w_shp | w_exp]^T: planar x/y/z column layout, zero-padded to
        n3_pad, quantized to int8 with per-row scales (folded into alpha),
      * u: same planar permutation + zero pad, stored in bf16,
      * block-diagonal global-average-pooling matrix."""
    attr_perm = np.concatenate([np.arange(12, 62), np.arange(0, 12),
                                np.arange(62, N_ATTR)])

    def pad_attr(a):                      # (rows, 102) -> (rows, 128)
        a = np.asarray(a, np.float32)[:, attr_perm]
        return np.pad(a, ((0, 0), (0, N_ATTR_PAD - N_ATTR)))

    wh_p = jnp.asarray(pad_attr(Wh))
    bh_p = jnp.asarray(pad_attr(bh))
    std_p = jnp.asarray(pad_attr(param_std))
    mean_p = jnp.asarray(pad_attr(param_mean))

    hw = H * W
    pool = np.zeros((B, B * hw), np.float32)
    for b in range(B):
        pool[b, b * hw:(b + 1) * hw] = 1.0 / hw
    pool_mat = jnp.asarray(pool)

    wT = np.concatenate([np.asarray(w_shp, np.float32),
                         np.asarray(w_exp, np.float32)], axis=1).T   # (50, 3*NV)
    n3 = wT.shape[1]
    nv = n3 // 3
    # planar column d*NV + v  <-  interleaved column 3*v + d
    vert_perm = (np.arange(nv)[None, :] * 3 + np.arange(3)[:, None]).reshape(-1)
    wT = np.pad(wT[:, vert_perm], ((0, 0), (0, n3_pad - n3)))
    u_planar = np.pad(np.asarray(u, np.float32)[:, vert_perm],
                      ((0, 0), (0, n3_pad - n3)))

    # per-row symmetric int8 quantization; scales are folded into alpha in-kernel
    absmax = np.abs(wT).max(axis=1, keepdims=True)
    scale = np.where(absmax > 0, absmax / 127.0, 1.0).astype(np.float32)
    wq = np.clip(np.rint(wT / scale), -127, 127).astype(np.int8)
    row_scale = jnp.asarray(scale.reshape(1, N_ALPHA))

    return (pool_mat,
            jnp.asarray(Wc, jnp.float32), jnp.asarray(bc, jnp.float32),
            wh_p, bh_p, std_p, mean_p,
            row_scale, jnp.asarray(wq), jnp.asarray(u_planar, jnp.bfloat16))


# ---------------------------------------------------------------------------
# Main
# ---------------------------------------------------------------------------
if __name__ == "__main__":
    key = jax.random.PRNGKey(0)
    ks = jax.random.split(key, 10)

    x = jax.random.normal(ks[0], (B, C_IN, H, W), jnp.float32)

    # "Checkpoint" tensors in the ORIGINAL (torch-module) layouts.
    Wc = jax.random.normal(ks[1], (C_IN, C_MID), jnp.float32) * 0.1
    bc = jax.random.normal(ks[2], (1, C_MID), jnp.float32) * 0.01
    Wh = jax.random.normal(ks[3], (C_MID, N_ATTR), jnp.float32) * 0.1
    bh = jax.random.normal(ks[4], (1, N_ATTR), jnp.float32) * 0.01
    param_std = jnp.abs(jax.random.normal(ks[5], (1, N_ATTR), jnp.float32)) * 0.5 + 0.1
    param_mean = jax.random.normal(ks[6], (1, N_ATTR), jnp.float32) * 0.1
    w_shp = jax.random.normal(ks[7], (N3, N_SHP), jnp.float32) * 0.05
    w_exp = jax.random.normal(ks[8], (N3, N_EXP), jnp.float32) * 0.05
    u = jax.random.normal(ks[9], (1, N3), jnp.float32)

    # At real scale (NV=53215) use target_tn≈8192 (default); the demo uses a
    # small tile so the multi-tile, head-hoisted pipeline is actually exercised.
    plan = _plan_vertex_tiling(N3, target_tn=512)

    params = _prepare_params(Wc, bc, Wh, bh, param_std, param_mean,
                             w_shp, w_exp, u, n3_pad=plan[3])

    fwd = jax.jit(igm_forward, static_argnames=("plan",))
    out = jax.block_until_ready(fwd(x, params, plan=plan))
    assert out.shape == (B, 3, NUM_VERTS), out.shape

    # ---------------- numpy reference (same math as the torch module,
    # original unpermuted f32 buffers — also validates layout folding + quant) -
    xn = np.asarray(x, np.float32)
    x_flat_n = np.transpose(xn, (0, 2, 3, 1)).reshape(B * H * W, C_IN)
    feat_n = np.clip(x_flat_n @ np.asarray(Wc) + np.asarray(bc), 0.0, 6.0)
    pooled_n = feat_n.reshape(B, H * W, C_MID).mean(axis=1)
    attr_n = pooled_n @ np.asarray(Wh) + np.asarray(bh)
    pw_n = attr_n * np.asarray(param_std) + np.asarray(param_mean)
    s_n = (np.linalg.norm(pw_n[:, 0:3], axis=1)
           + np.linalg.norm(pw_n[:, 4:7], axis=1)) / 2.0
    alpha_n = pw_n[:, 12:62]
    wT_n = np.concatenate([np.asarray(w_shp), np.asarray(w_exp)], axis=1).T
    full_n = np.asarray(u) + alpha_n @ wT_n                      # (B, 3*NV)
    ref = (s_n[:, None] * full_n).reshape(B, NUM_VERTS, 3).transpose(0, 2, 1)

    np.testing.assert_allclose(np.asarray(out), ref, rtol=2e-2, atol=2e-2)
    print("KERNEL_OK")
</pallas_src>

<mosaic_0001>
module attributes {stable_mosaic.version = 11 : i64} {
  func.func @igm_fused_kernel(%arg0: i32, %arg1: i32, %arg2: memref<512x4xf32, #tpu.memory_space<vmem>>, %arg3: memref<2x512xf32, #tpu.memory_space<vmem>>, %arg4: memref<4x32xf32, #tpu.memory_space<vmem>>, %arg5: memref<1x32xf32, #tpu.memory_space<vmem>>, %arg6: memref<32x128xf32, #tpu.memory_space<vmem>>, %arg7: memref<1x128xf32, #tpu.memory_space<vmem>>, %arg8: memref<1x128xf32, #tpu.memory_space<vmem>>, %arg9: memref<1x128xf32, #tpu.memory_space<vmem>>, %arg10: memref<1x50xf32, #tpu.memory_space<vmem>>, %arg11: memref<50x512xi8, #tpu.memory_space<vmem>>, %arg12: memref<1x512xbf16, #tpu.memory_space<vmem>>, %arg13: memref<2x512xf32, #tpu.memory_space<vmem>>, %arg14: memref<2x50xf32, #tpu.memory_space<vmem>>, %arg15: memref<2x1xf32, #tpu.memory_space<vmem>>) attributes {dimension_semantics = [#tpu.dimension_semantics<parallel>, #tpu.dimension_semantics<arbitrary>], iteration_bounds = array<i64: 1, 6>, scalar_prefetch = 0 : i64, scratch_operands = 2 : i64, tpu.core_type = #tpu.core_type<tc>, window_params = [{pipeline_mode = #tpu.pipeline_mode<synchronous>, transform_indices = @transform_0, window_bounds = array<i64: 512, 4>}, {pipeline_mode = #tpu.pipeline_mode<synchronous>, transform_indices = @transform_1, window_bounds = array<i64: 2, 512>}, {pipeline_mode = #tpu.pipeline_mode<synchronous>, transform_indices = @transform_2, window_bounds = array<i64: 4, 32>}, {pipeline_mode = #tpu.pipeline_mode<synchronous>, transform_indices = @transform_3, window_bounds = array<i64: 1, 32>}, {pipeline_mode = #tpu.pipeline_mode<synchronous>, transform_indices = @transform_4, window_bounds = array<i64: 32, 128>}, {pipeline_mode = #tpu.pipeline_mode<synchronous>, transform_indices = @transform_5, window_bounds = array<i64: 1, 128>}, {pipeline_mode = #tpu.pipeline_mode<synchronous>, transform_indices = @transform_6, window_bounds = array<i64: 1, 128>}, {pipeline_mode = #tpu.pipeline_mode<synchronous>, transform_indices = @transform_7, window_bounds = array<i64: 1, 128>}, {pipeline_mode = #tpu.pipeline_mode<synchronous>, transform_indices = @transform_8, window_bounds = array<i64: 1, 50>}, {transform_indices = @transform_9, window_bounds = array<i64: 50, 512>}, {transform_indices = @transform_10, window_bounds = array<i64: 1, 512>}, {transform_indices = @transform_11, window_bounds = array<i64: 2, 512>}]} {
    %c0_i32 = arith.constant 0 : i32
    %0 = arith.cmpi eq, %arg1, %c0_i32 : i32
    %1 = arith.extui %0 : i1 to i32
    %c0_i32_0 = arith.constant 0 : i32
    %2 = arith.cmpi ne, %1, %c0_i32_0 : i32
    scf.if %2 {
      %c0_10 = arith.constant 0 : index
      %c0_11 = arith.constant 0 : index
      %15 = vector.load %arg2[%c0_10, %c0_11] : memref<512x4xf32, #tpu.memory_space<vmem>>, vector<512x4xf32>
      %c0_12 = arith.constant 0 : index
      %c0_13 = arith.constant 0 : index
      %16 = vector.load %arg4[%c0_12, %c0_13] : memref<4x32xf32, #tpu.memory_space<vmem>>, vector<4x32xf32>
      %cst_14 = arith.constant dense<0.000000e+00> : vector<512x32xf32>
      %17 = tpu.matmul %15, %16, %cst_14 {dimension_numbers = #tpu.dot_dimension_numbers<[1], [0], [0], [1], [0, 0, 1, 1], [], []>} : vector<512x4xf32>, vector<4x32xf32>, vector<512x32xf32> -> vector<512x32xf32>
      %c0_15 = arith.constant 0 : index
      %c0_16 = arith.constant 0 : index
      %18 = vector.load %arg5[%c0_15, %c0_16] : memref<1x32xf32, #tpu.memory_space<vmem>>, vector<1x32xf32>
      %19 = vector.broadcast %18 : vector<1x32xf32> to vector<512x32xf32>
      %20 = arith.addf %17, %19 : vector<512x32xf32>
      %cst_17 = arith.constant 0.000000e+00 : f32
      %cst_18 = arith.constant 6.000000e+00 : f32
      %21 = vector.broadcast %cst_17 : f32 to vector<512x32xf32>
      %22 = arith.maximumf %21, %20 : vector<512x32xf32>
      %23 = vector.broadcast %cst_18 : f32 to vector<512x32xf32>
      %24 = arith.minimumf %23, %22 : vector<512x32xf32>
      %c0_19 = arith.constant 0 : index
      %c0_20 = arith.constant 0 : index
      %25 = vector.load %arg3[%c0_19, %c0_20] : memref<2x512xf32, #tpu.memory_space<vmem>>, vector<2x512xf32>
      %cst_21 = arith.constant dense<0.000000e+00> : vector<2x32xf32>
      %26 = tpu.matmul %25, %24, %cst_21 {dimension_numbers = #tpu.dot_dimension_numbers<[1], [0], [0], [1], [0, 0, 1, 1], [], []>} : vector<2x512xf32>, vector<512x32xf32>, vector<2x32xf32> -> vector<2x32xf32>
      %c0_22 = arith.constant 0 : index
      %c0_23 = arith.constant 0 : index
      %27 = vector.load %arg6[%c0_22, %c0_23] : memref<32x128xf32, #tpu.memory_space<vmem>>, vector<32x128xf32>
      %cst_24 = arith.constant dense<0.000000e+00> : vector<2x128xf32>
      %28 = tpu.matmul %26, %27, %cst_24 {dimension_numbers = #tpu.dot_dimension_numbers<[1], [0], [0], [1], [0, 0, 1, 1], [], []>} : vector<2x32xf32>, vector<32x128xf32>, vector<2x128xf32> -> vector<2x128xf32>
      %c0_25 = arith.constant 0 : index
      %c0_26 = arith.constant 0 : index
      %29 = vector.load %arg7[%c0_25, %c0_26] : memref<1x128xf32, #tpu.memory_space<vmem>>, vector<1x128xf32>
      %30 = vector.broadcast %29 : vector<1x128xf32> to vector<2x128xf32>
      %31 = arith.addf %28, %30 : vector<2x128xf32>
      %c0_27 = arith.constant 0 : index
      %c0_28 = arith.constant 0 : index
      %32 = vector.load %arg8[%c0_27, %c0_28] : memref<1x128xf32, #tpu.memory_space<vmem>>, vector<1x128xf32>
      %33 = vector.broadcast %32 : vector<1x128xf32> to vector<2x128xf32>
      %34 = arith.mulf %31, %33 : vector<2x128xf32>
      %c0_29 = arith.constant 0 : index
      %c0_30 = arith.constant 0 : index
      %35 = vector.load %arg9[%c0_29, %c0_30] : memref<1x128xf32, #tpu.memory_space<vmem>>, vector<1x128xf32>
      %36 = vector.broadcast %35 : vector<1x128xf32> to vector<2x128xf32>
      %37 = arith.addf %34, %36 : vector<2x128xf32>
      %38 = tpu.iota {dimensions = array<i32: 1>} : vector<2x128xi32>
      %39 = arith.mulf %37, %37 : vector<2x128xf32>
      %c50_i32 = arith.constant 50 : i32
      %40 = vector.broadcast %c50_i32 : i32 to vector<2x128xi32>
      %41 = arith.cmpi sge, %38, %40 : vector<2x128xi32>
      %c53_i32 = arith.constant 53 : i32
      %42 = vector.broadcast %c53_i32 : i32 to vector<2x128xi32>
      %43 = arith.cmpi slt, %38, %42 : vector<2x128xi32>
      %44 = arith.andi %41, %43 : vector<2x128xi1>
      %cst_31 = arith.constant 0.000000e+00 : f32
      %45 = vector.broadcast %cst_31 : f32 to vector<2x128xf32>
      %46 = arith.select %44, %39, %45 : vector<2x128xi1>, vector<2x128xf32>
      %cst_32 = arith.constant dense<0.000000e+00> : vector<2xf32>
      %47 = vector.multi_reduction <add>, %46, %cst_32 [1] : vector<2x128xf32> to vector<2xf32>
      %48 = vector.shape_cast %47 : vector<2xf32> to vector<2x1xf32>
      %49 = math.sqrt %48 : vector<2x1xf32>
      %c54_i32 = arith.constant 54 : i32
      %50 = vector.broadcast %c54_i32 : i32 to vector<2x128xi32>
      %51 = arith.cmpi sge, %38, %50 : vector<2x128xi32>
      %c57_i32 = arith.constant 57 : i32
      %52 = vector.broadcast %c57_i32 : i32 to vector<2x128xi32>
      %53 = arith.cmpi slt, %38, %52 : vector<2x128xi32>
      %54 = arith.andi %51, %53 : vector<2x128xi1>
      %cst_33 = arith.constant 0.000000e+00 : f32
      %55 = vector.broadcast %cst_33 : f32 to vector<2x128xf32>
      %56 = arith.select %54, %39, %55 : vector<2x128xi1>, vector<2x128xf32>
      %cst_34 = arith.constant dense<0.000000e+00> : vector<2xf32>
      %57 = vector.multi_reduction <add>, %56, %cst_34 [1] : vector<2x128xf32> to vector<2xf32>
      %58 = vector.shape_cast %57 : vector<2xf32> to vector<2x1xf32>
      %59 = math.sqrt %58 : vector<2x1xf32>
      %60 = arith.addf %49, %59 : vector<2x1xf32>
      %cst_35 = arith.constant 5.000000e-01 : f32
      %61 = vector.broadcast %cst_35 : f32 to vector<2x1xf32>
      %62 = arith.mulf %60, %61 : vector<2x1xf32>
      %c0_36 = arith.constant 0 : index
      %c0_37 = arith.constant 0 : index
      %63 = vector.load %arg15[%c0_36, %c0_37] : memref<2x1xf32, #tpu.memory_space<vmem>>, vector<2x1xf32>
      tpu.vector_store %arg15[%c0_36, %c0_37], %62 {strides = array<i32>} : memref<2x1xf32, #tpu.memory_space<vmem>>, vector<2x1xf32>,
      %64 = vector.extract_strided_slice %37 {offsets = [0, 0], sizes = [2, 50], strides = [1, 1]} : vector<2x128xf32> to vector<2x50xf32>
      %c0_38 = arith.constant 0 : index
      %c0_39 = arith.constant 0 : index
      %65 = vector.load %arg10[%c0_38, %c0_39] : memref<1x50xf32, #tpu.memory_space<vmem>>, vector<1x50xf32>
      %66 = vector.broadcast %65 : vector<1x50xf32> to vector<2x50xf32>
      %67 = arith.mulf %64, %66 : vector<2x50xf32>
      %68 = vector.broadcast %62 : vector<2x1xf32> to vector<2x50xf32>
      %69 = arith.mulf %67, %68 : vector<2x50xf32>
      %c0_40 = arith.constant 0 : index
      %c0_41 = arith.constant 0 : index
      %70 = vector.load %arg14[%c0_40, %c0_41] : memref<2x50xf32, #tpu.memory_space<vmem>>, vector<2x50xf32>
      tpu.vector_store %arg14[%c0_40, %c0_41], %69 {strides = array<i32>} : memref<2x50xf32, #tpu.memory_space<vmem>>, vector<2x50xf32>,
    } else {
    }
    %c0 = arith.constant 0 : index
    %c0_1 = arith.constant 0 : index
    %3 = vector.load %arg11[%c0, %c0_1] : memref<50x512xi8, #tpu.memory_space<vmem>>, vector<50x512xi8>
    %4 = arith.sitofp %3 : vector<50x512xi8> to vector<50x512xf32>
    %c0_2 = arith.constant 0 : index
    %c0_3 = arith.constant 0 : index
    %5 = vector.load %arg14[%c0_2, %c0_3] : memref<2x50xf32, #tpu.memory_space<vmem>>, vector<2x50xf32>
    %cst = arith.constant dense<0.000000e+00> : vector<2x512xf32>
    %6 = tpu.matmul %5, %4, %cst {dimension_numbers = #tpu.dot_dimension_numbers<[1], [0], [0], [1], [0, 0, 1, 1], [], []>} : vector<2x50xf32>, vector<50x512xf32>, vector<2x512xf32> -> vector<2x512xf32>
    %c0_4 = arith.constant 0 : index
    %c0_5 = arith.constant 0 : index
    %7 = vector.load %arg15[%c0_4, %c0_5] : memref<2x1xf32, #tpu.memory_space<vmem>>, vector<2x1xf32>
    %c0_6 = arith.constant 0 : index
    %c0_7 = arith.constant 0 : index
    %8 = vector.load %arg12[%c0_6, %c0_7] : memref<1x512xbf16, #tpu.memory_space<vmem>>, vector<1x512xbf16>
    %9 = arith.extf %8 : vector<1x512xbf16> to vector<1x512xf32>
    %10 = vector.broadcast %7 : vector<2x1xf32> to vector<2x512xf32>
    %11 = vector.broadcast %9 : vector<1x512xf32> to vector<2x512xf32>
    %12 = arith.mulf %10, %11 : vector<2x512xf32>
    %13 = arith.addf %6, %12 : vector<2x512xf32>
    %c0_8 = arith.constant 0 : index
    %c0_9 = arith.constant 0 : index
    %14 = vector.load %arg13[%c0_8, %c0_9] : memref<2x512xf32, #tpu.memory_space<vmem>>, vector<2x512xf32>
    tpu.vector_store %arg13[%c0_8, %c0_9], %13 {strides = array<i32>} : memref<2x512xf32, #tpu.memory_space<vmem>>, vector<2x512xf32>,
    return
  }
  func.func @transform_0(%arg0: i32, %arg1: i32) -> (i32, i32) {
    %c0_i32 = arith.constant 0 : i32
    %c0_i32_0 = arith.constant 0 : i32
    %c0_i32_1 = arith.constant 0 : i32
    return %c0_i32, %c0_i32_0 : i32, i32
  }
  func.func @transform_1(%arg0: i32, %arg1: i32) -> (i32, i32) {
    %c0_i32 = arith.constant 0 : i32
    %c0_i32_0 = arith.constant 0 : i32
    %c0_i32_1 = arith.constant 0 : i32
    return %c0_i32, %c0_i32_0 : i32, i32
  }
  func.func @transform_2(%arg0: i32, %arg1: i32) -> (i32, i32) {
    %c0_i32 = arith.constant 0 : i32
    %c0_i32_0 = arith.constant 0 : i32
    %c0_i32_1 = arith.constant 0 : i32
    return %c0_i32, %c0_i32_0 : i32, i32
  }
  func.func @transform_3(%arg0: i32, %arg1: i32) -> (i32, i32) {
    %c0_i32 = arith.constant 0 : i32
    %c0_i32_0 = arith.constant 0 : i32
    %c0_i32_1 = arith.constant 0 : i32
    return %c0_i32, %c0_i32_0 : i32, i32
  }
  func.func @transform_4(%arg0: i32, %arg1: i32) -> (i32, i32) {
    %c0_i32 = arith.constant 0 : i32
    %c0_i32_0 = arith.constant 0 : i32
    %c0_i32_1 = arith.constant 0 : i32
    return %c0_i32, %c0_i32_0 : i32, i32
  }
  func.func @transform_5(%arg0: i32, %arg1: i32) -> (i32, i32) {
    %c0_i32 = arith.constant 0 : i32
    %c0_i32_0 = arith.constant 0 : i32
    %c0_i32_1 = arith.constant 0 : i32
    return %c0_i32, %c0_i32_0 : i32, i32
  }
  func.func @transform_6(%arg0: i32, %arg1: i32) -> (i32, i32) {
    %c0_i32 = arith.constant 0 : i32
    %c0_i32_0 = arith.constant 0 : i32
    %c0_i32_1 = arith.constant 0 : i32
    return %c0_i32, %c0_i32_0 : i32, i32
  }
  func.func @transform_7(%arg0: i32, %arg1: i32) -> (i32, i32) {
    %c0_i32 = arith.constant 0 : i32
    %c0_i32_0 = arith.constant 0 : i32
    %c0_i32_1 = arith.constant 0 : i32
    return %c0_i32, %c0_i32_0 : i32, i32
  }
  func.func @transform_8(%arg0: i32, %arg1: i32) -> (i32, i32) {
    %c0_i32 = arith.constant 0 : i32
    %c0_i32_0 = arith.constant 0 : i32
    %c0_i32_1 = arith.constant 0 : i32
    return %c0_i32, %c0_i32_0 : i32, i32
  }
  func.func @transform_9(%arg0: i32, %arg1: i32) -> (i32, i32) {
    %c6_i32 = arith.constant 6 : i32
    %0 = arith.muli %arg0, %c6_i32 : i32
    %1 = arith.addi %0, %arg1 : i32
    %c0_i32 = arith.constant 0 : i32
    %c0_i32_0 = arith.constant 0 : i32
    return %c0_i32, %1 : i32, i32
  }
  func.func @transform_10(%arg0: i32, %arg1: i32) -> (i32, i32) {
    %c6_i32 = arith.constant 6 : i32
    %0 = arith.muli %arg0, %c6_i32 : i32
    %1 = arith.addi %0, %arg1 : i32
    %c0_i32 = arith.constant 0 : i32
    %c0_i32_0 = arith.constant 0 : i32
    return %c0_i32, %1 : i32, i32
  }
  func.func @transform_11(%arg0: i32, %arg1: i32) -> (i32, i32) {
    %c6_i32 = arith.constant 6 : i32
    %0 = arith.muli %arg0, %c6_i32 : i32
    %1 = arith.addi %0, %arg1 : i32
    %c0_i32 = arith.constant 0 : i32
    %c0_i32_0 = arith.constant 0 : i32
    return %c0_i32, %1 : i32, i32
  }
}

</mosaic_0001>

<bundles_post_ra>
// kernel: igm_forward.1
= control target key start
LH: loop header
LB: loop body
LE: loop exit
PB: predicated region body
PF: predicated region fallthrough
CT: control target
= control target key end

     0   :  { %s2516_s0 = inlined_call_operand.vmem [shape: f32[512,4], index: 0, kind: input, shape index: {}]   ;;  %s2517_s1 = inlined_call_operand.vmem [shape: f32[2,512], index: 1, kind: input, shape index: {}]   ;;  %s2518_s2 = inlined_call_operand.vmem [shape: f32[4,32], index: 2, kind: input, shape index: {}]   ;;  %s2519_s3 = inlined_call_operand.vmem [shape: f32[1,32], index: 3, kind: input, shape index: {}]   ;;  %s2520_s4 = inlined_call_operand.vmem [shape: f32[32,128], index: 4, kind: input, shape index: {}]   ;;  %s2521_s5 = inlined_call_operand.vmem [shape: f32[1,128], index: 5, kind: input, shape index: {}]   ;;  %s2522_s6 = inlined_call_operand.vmem [shape: f32[1,128], index: 6, kind: input, shape index: {}]   ;;  %s2523_s7 = inlined_call_operand.vmem [shape: f32[1,128], index: 7, kind: input, shape index: {}]   ;;  %s2524_s8 = inlined_call_operand.vmem [shape: f32[1,50], index: 8, kind: input, shape index: {}]   ;;  %s2525_s9 = inlined_call_operand.vmem [shape: s8[50,3072], index: 9, kind: input, shape index: {}]   ;;  %s2526_s10 = inlined_call_operand.vmem [shape: bf16[1,3072], index: 10, kind: input, shape index: {}]   ;;  %s2527_s11 = inlined_call_operand.hbm [shape: f32[2,3072], index: 11, kind: output, shape index: {}]  }
   0x1   :  { %2531 = sst [smem:[#allocation12_spill]] %s2525_s9 }
   0x2   :  { %16 = vsyncpa [#allocation6], 0 }
   0x3   :  { %18 = vsyncpa [#allocation6 + $0x1], 0  ;;  %s1908_s17 = smov 0   ;;  %s1910_s18 = smov 0  }
   0x4   :  { %s1912_s19 = smov 0   ;;  %s1914_s20 = smov 0  }
   0x5   :  { %s1916_s21 = smov 0   ;;  %s1918_s22 = smov 0  }
   0x6 LB: > { %2532 = sst [smem:[#allocation8_spill]] %s1833_s19  ;;  %s1605_s23 = sadd.s32 4294967295, %s1845_s22   ;;  %s1845_s22 = sphi %s1918_s22, %s24_s22   ;;  %s1841_s21 = sphi %s1916_s21, %s2542_s21   ;;  %s1837_s20 = sphi %s1914_s20, %s2541_s20   ;;  %s1833_s19 = sphi %s1912_s19, %s2540_s19   ;;  %s1829_s18 = sphi %s1910_s18, %s2544_s18   ;;  %s1825_s17 = sphi %s1908_s17, %s2543_s17  }
   0x7   : > { %2533 = sst [smem:[#allocation9_spill]] %s1841_s21  ;;  %s1606_s24 = sadd.s32 4294967294, %s1845_s22  }
   0x8   : > { %s33_s25 = sadd.s32 1, %s1841_s21  ;;  %s236_s26 = sadd.s32 1, %s1833_s19 }
   0x9   : > { %p34_p0 = scmp.ge.s32.totalorder %s33_s25, 6  ;;  %p243_p1 = scmp.ne.s32.totalorder %s1833_s19, %s1829_s18 }
   0xa   : > { %p244_p2 = scmp.eq.s32.totalorder %s1845_s22, 0  ;;  %p307_p3 = scmp.eq.s32.totalorder %s1605_s23, 5 }
   0xb   : > { %s2546_s25 = smov (%p34_p0, %s33_s25), 0  ;;  %p312_p6 = scmp.ne.s32.totalorder %s1829_s18, %s1825_s17 }
   0xc   : > { %2534 = sst [smem:[#allocation10_spill]] %s2546_s25  ;;  %p245_p4 = por %p244_p2, %p243_p1 }
   0xd   : > { %p1947_p5 = por %p307_p3, %p243_p1  ;;  %s233_s28 = ssub.s32 %s1841_s21, %s2546_s25 }
   0xe   : > { %p234_p7 = scmp.eq.s32.totalorder %s233_s28, 0  ;;  %p313_p8 = scmp.eq.s32.totalorder %s1606_s24, 5 }
   0xf   : > { %p1608_p10 = scmp.ge.s32.totalorder %s1845_s22, 6 }
  0x10   : > { %s1956_s29 = scalar_select %p234_p7, %s1833_s19, %s236_s26  }
  0x11   : > { %p1958_p9 = por %p313_p8, %p312_p6  ;;  %356 = sbr.rel (%p1608_p10) target bundleno = 39 (0x27), region = 52 }
  0x12   : > { %2536 = sst [smem:[#allocation11_spill]] %s1956_s29 }
  0x16   : > { %359 = sbr.rel (!%p245_p4) target bundleno = 39 (0x27), region = 56  ;;  %s361_s12 = sand.u32 (%p245_p4), 1, %s1833_s19  }
  0x17   : > { %s1694_s13 = sshll.u32 (%p245_p4), %s1841_s21, 3  ;;  %s1699_s14 = smul.u32 (%p245_p4), 56, %s361_s12 }
  0x18   : > { %s2538_s9 = sld [smem:[#allocation12_spill]] (%p245_p4) }
  0x19   : > { %s363_s24 = scalar_lea.vmem (%p245_p4), [#allocation4], %s1699_s14 }
  0x1e   : > { %s368_s23 = scalar_lea.vmem %s2538_s9, %s1694_s13 }
  0x1f   : > { %v409_v0 = vld [vmem:[%s368_s23] sm:$0xff]  ;;  %v411_v1 = vld [vmem:[%s368_s23 + $0x30] sm:$0xff] }
  0x20   : > { %v413_v2 = vld [vmem:[%s368_s23 + $0x60] sm:$0xff]  ;;  %410 = vst [vmem:[%s363_s24] sm:$0xff] %v409_v0  ;;  %v415_v3 = vld [vmem:[%s368_s23 + $0x90] sm:$0xff] }
  0x21   : > { %412 = vst [vmem:[%s363_s24 + $0x8] sm:$0xff] %v411_v1  ;;  %v417_v4 = vld [vmem:[%s368_s23 + $0xc0] sm:$0xff]  ;;  %v419_v5 = vld [vmem:[%s368_s23 + $0xf0] sm:$0xff] }
  0x22   : > { %414 = vst [vmem:[%s363_s24 + $0x10] sm:$0xff] %v413_v2  ;;  %v421_v6 = vld [vmem:[%s368_s23 + $0x120] sm:$0xff] }
  0x23   : > { %416 = vst [vmem:[%s363_s24 + $0x18] sm:$0xff] %v415_v3 }
  0x24   : > { %418 = vst [vmem:[%s363_s24 + $0x20] sm:$0xff] %v417_v4 }
  0x25   : > { %420 = vst [vmem:[%s363_s24 + $0x28] sm:$0xff] %v419_v5 }
  0x26   : > { %422 = vst [vmem:[%s363_s24 + $0x30] sm:$0xff] %v421_v6 }
  0x27 PF: > { %p1611_p11 = scmp.ge.s32.totalorder %s1845_s22, 1  ;;  %p439_p12 = scmp.lt.s32.totalorder %s1845_s22, 7 }
  0x29   : > { %p440_p13 = pnand %p1611_p11, %p439_p12 }
  0x2a   : > { %s1971_s26 = sand.u32 (!%p440_p13), 1, %s1829_s18   ;;  %s1613_s28 = sshll.u32 (!%p440_p13), %s1837_s20, 2 }
  0x2b   : > { %443 = sbr.rel (%p440_p13) target bundleno = 951 (0x3b7), region = 98  ;;  %s1612_s13 = sshll.u32 (!%p440_p13), %s1971_s26, 3 }
  0x2c   : > { %s1700_s12 = smul.u32 (!%p440_p13), 56, %s1971_s26  ;;  %p497_p0 = scmp.lt.s32.totalorder (!%p440_p13), %s1613_s28, 23 }
  0x2d   : > { %s1984_s24 = scalar_lea.vmem (!%p440_p13), [#allocation5], %s1612_s13  ;;  %p1614_p1 = scmp.ne.s32.totalorder (!%p440_p13), %s1837_s20, 0 }
  0x2e   : > { %s1982_s23 = scalar_lea.vmem (!%p440_p13), [#allocation4], %s1700_s12 }
  0x30   : > { %s2548_s28 = smov (!%p497_p0, %s1613_s28), 23  ;;  %509 = sbr.rel (%p1614_p1) target bundleno = 792 (0x318), region = 106 }
  0x31   : > { %s499_s16 = scalar_lea.vmem %s2526_s10, %s2548_s28 }
  0x35   : > { %v574_v7 = vld [vmem:[%s2518_s2] sm:$0xf]  ;;  %vm772_vm0 = vcmask 1043456   ;;  %vm579_vm1 = vcmask 31744   ;;  %v540_v10 = vld [vmem:[%s2516_s0 + $0xf0] sm:$0xff]  ;;  %v511_v12 = vld [vmem:[%s2516_s0 + $0x8] sm:$0xff] }
  0x36   : > { %v510_v8 = vld [vmem:[%s2516_s0] sm:$0xff]  ;;  %1615 = vmatpush.msk.msra.mxu0 %vm772_vm0, %v574_v7  ;;  %1696 = vmatpush.msk.msra.mxu1 %vm772_vm0, %v574_v7  ;;  %v556_v11 = vld [vmem:[%s2516_s0 + $0x170] sm:$0xff]  ;;  %v531_v13 = vld [vmem:[%s2516_s0 + $0xa8] sm:$0xff]  ;;  %vm1212_vm2 = vcmask 261120   ;;  %vm1253_vm6 = vcmask 1041408   ;;  %vm1290_vm14 = vcmask 1024  }
  0x37   : > { %v530_v9 = vld [vmem:[%s2516_s0 + $0xa0] sm:$0xff]  ;;  %1697 = vmatpush.msk.msra.mxu2 %vm772_vm0, %v574_v7  ;;  %1616 = vmatmul.msk.f32.vlgmr.msra.gmra.mxu0 %vm579_vm1, %v510_v8  ;;  %v541_v14 = vld [vmem:[%s2516_s0 + $0xf8] sm:$0xff]  ;;  %v512_v16 = vld [vmem:[%s2516_s0 + $0x10] sm:$0xff]  ;;  %vm1298_vm15 = vcmask 402432  }
  0x38   : > { %1636 = vmatmul.msk.f32.vlgmr.msra.gmra.mxu1 %vm579_vm1, %v530_v9  ;;  %1646 = vmatmul.msk.f32.vlgmr.msra.gmra.mxu2 %vm579_vm1, %v540_v10  ;;  %v557_v15 = vld [vmem:[%s2516_s0 + $0x178] sm:$0xff]  ;;  %v532_v17 = vld [vmem:[%s2516_s0 + $0xb0] sm:$0xff]  ;;  %v542_v18 = vld [vmem:[%s2516_s0 + $0x100] sm:$0xff] }
  0x39   : > { %1698 = vmatpush.msk.msra.mxu3 %vm772_vm0, %v574_v7  ;;  %v558_v19 = vld [vmem:[%s2516_s0 + $0x180] sm:$0xff]  ;;  %v513_v20 = vld [vmem:[%s2516_s0 + $0x18] sm:$0xff]  ;;  %v543_v22 = vld [vmem:[%s2516_s0 + $0x108] sm:$0xff] }
  0x3a   : > { %1662 = vmatmul.msk.f32.vlgmr.msra.gmra.mxu3 %vm579_vm1, %v556_v11  ;;  %v533_v21 = vld [vmem:[%s2516_s0 + $0xb8] sm:$0xff]  ;;  %v559_v23 = vld [vmem:[%s2516_s0 + $0x188] sm:$0xff]  ;;  %v514_v24 = vld [vmem:[%s2516_s0 + $0x20] sm:$0xff] }
  0x3b   : > { %v534_v25 = vld [vmem:[%s2516_s0 + $0xc0] sm:$0xff]  ;;  %v544_v26 = vld [vmem:[%s2516_s0 + $0x110] sm:$0xff]  ;;  %v515_v28 = vld [vmem:[%s2516_s0 + $0x28] sm:$0xff] }
  0x3c   : > { %v560_v27 = vld [vmem:[%s2516_s0 + $0x190] sm:$0xff]  ;;  %v535_v29 = vld [vmem:[%s2516_s0 + $0xc8] sm:$0xff]  ;;  %v545_v30 = vld [vmem:[%s2516_s0 + $0x118] sm:$0xff] }
  0x3d   : > { %v561_v31 = vld [vmem:[%s2516_s0 + $0x198] sm:$0xff]  ;;  %v516_v32 = vld [vmem:[%s2516_s0 + $0x30] sm:$0xff]  ;;  %v546_v34 = vld [vmem:[%s2516_s0 + $0x120] sm:$0xff] }
  0x3e   : > { %v536_v33 = vld [vmem:[%s2516_s0 + $0xd0] sm:$0xff]  ;;  %v562_v35 = vld [vmem:[%s2516_s0 + $0x1a0] sm:$0xff]  ;;  %v517_v36 = vld [vmem:[%s2516_s0 + $0x38] sm:$0xff] }
  0x3f   : > { %1617 = vmatmul.msk.f32.gmra.mxu0 %vm579_vm1, %v511_v12  ;;  %v537_v37 = vld [vmem:[%s2516_s0 + $0xd8] sm:$0xff]  ;;  %v547_v38 = vld [vmem:[%s2516_s0 + $0x128] sm:$0xff]  ;;  %v518_v40 = vld [vmem:[%s2516_s0 + $0x40] sm:$0xff] }
  0x40   : > { %1637 = vmatmul.msk.f32.gmra.mxu1 %vm579_vm1, %v531_v13  ;;  %1647 = vmatmul.msk.f32.gmra.mxu2 %vm579_vm1, %v541_v14  ;;  %v563_v39 = vld [vmem:[%s2516_s0 + $0x1a8] sm:$0xff]  ;;  %v538_v41 = vld [vmem:[%s2516_s0 + $0xe0] sm:$0xff]  ;;  %v548_v42 = vld [vmem:[%s2516_s0 + $0x130] sm:$0xff] }
  0x41   : > { %v564_v43 = vld [vmem:[%s2516_s0 + $0x1b0] sm:$0xff]  ;;  %v519_v44 = vld [vmem:[%s2516_s0 + $0x48] sm:$0xff]  ;;  %v549_v46 = vld [vmem:[%s2516_s0 + $0x138] sm:$0xff] }
  0x42   : > { %1663 = vmatmul.msk.f32.gmra.mxu3 %vm579_vm1, %v557_v15  ;;  %v539_v45 = vld [vmem:[%s2516_s0 + $0xe8] sm:$0xff]  ;;  %v565_v47 = vld [vmem:[%s2516_s0 + $0x1b8] sm:$0xff]  ;;  %v520_v48 = vld [vmem:[%s2516_s0 + $0x50] sm:$0xff] }
  0x43   : > { %v550_v49 = vld [vmem:[%s2516_s0 + $0x140] sm:$0xff]  ;;  %v521_v51 = vld [vmem:[%s2516_s0 + $0x58] sm:$0xff]  ;;  %v551_v52 = vld [vmem:[%s2516_s0 + $0x148] sm:$0xff] }
  0x44   : > { %v566_v50 = vld [vmem:[%s2516_s0 + $0x1c0] sm:$0xff]  ;;  %v567_v53 = vld [vmem:[%s2516_s0 + $0x1c8] sm:$0xff]  ;;  %v552_v55 = vld [vmem:[%s2516_s0 + $0x150] sm:$0xff] }
  0x45   : > { %v522_v54 = vld [vmem:[%s2516_s0 + $0x60] sm:$0xff]  ;;  %v568_v56 = vld [vmem:[%s2516_s0 + $0x1d0] sm:$0xff]  ;;  %v523_v57 = vld [vmem:[%s2516_s0 + $0x68] sm:$0xff] }
  0x46   : > { %v553_v58 = vld [vmem:[%s2516_s0 + $0x158] sm:$0xff]  ;;  %v524_v60 = vld [vmem:[%s2516_s0 + $0x70] sm:$0xff]  ;;  %v554_v61 = vld [vmem:[%s2516_s0 + $0x160] sm:$0xff] }
  0x47   : > { %1618 = vmatmul.msk.f32.gmra.mxu0 %vm579_vm1, %v512_v16  ;;  %v569_v59 = vld [vmem:[%s2516_s0 + $0x1d8] sm:$0xff]  ;;  %v570_v62 = vld [vmem:[%s2516_s0 + $0x1e0] sm:$0xff]  ;;  %v555_v0 = vld [vmem:[%s2516_s0 + $0x168] sm:$0xff] }
  0x48   : > { %1638 = vmatmul.msk.f32.gmra.mxu1 %vm579_vm1, %v532_v17  ;;  %1648 = vmatmul.msk.f32.gmra.mxu2 %vm579_vm1, %v542_v18  ;;  %v525_v63 = vld [vmem:[%s2516_s0 + $0x78] sm:$0xff]  ;;  %v571_v1 = vld [vmem:[%s2516_s0 + $0x1e8] sm:$0xff]  ;;  %v526_v3 = vld [vmem:[%s2516_s0 + $0x80] sm:$0xff] }
  0x49   : > { %v572_v5 = vld [vmem:[%s2516_s0 + $0x1f0] sm:$0xff]  ;;  %v527_v8 = vld [vmem:[%s2516_s0 + $0x88] sm:$0xff]  ;;  %v2244_v11 = vld [vmem:[%s2519_s3] ss:$0 sm:$0xff] }
  0x4a   : > { %1664 = vmatmul.msk.f32.gmra.mxu3 %vm579_vm1, %v558_v19  ;;  %v573_v12 = vld [vmem:[%s2516_s0 + $0x1f8] sm:$0xff]  ;;  %v528_v19 = vld [vmem:[%s2516_s0 + $0x90] sm:$0xff] }
  0x4f   : > { %1619 = vmatmul.msk.f32.gmra.mxu0 %vm579_vm1, %v513_v20 }
  0x50   : > { %1639 = vmatmul.msk.f32.gmra.mxu1 %vm579_vm1, %v533_v21  ;;  %1649 = vmatmul.msk.f32.gmra.mxu2 %vm579_vm1, %v543_v22 }
  0x52   : > { %1665 = vmatmul.msk.f32.gmra.mxu3 %vm579_vm1, %v559_v23 }
  0x57   : > { %1620 = vmatmul.msk.f32.gmra.mxu0 %vm579_vm1, %v514_v24 }
  0x58   : > { %1640 = vmatmul.msk.f32.gmra.mxu1 %vm579_vm1, %v534_v25  ;;  %1650 = vmatmul.msk.f32.gmra.mxu2 %vm579_vm1, %v544_v26 }
  0x5a   : > { %1666 = vmatmul.msk.f32.gmra.mxu3 %vm579_vm1, %v560_v27 }
  0x5f   : > { %1621 = vmatmul.msk.f32.gmra.mxu0 %vm579_vm1, %v515_v28 }
  0x60   : > { %1641 = vmatmul.msk.f32.gmra.mxu1 %vm579_vm1, %v535_v29  ;;  %1651 = vmatmul.msk.f32.gmra.mxu2 %vm579_vm1, %v545_v30 }
  0x62   : > { %1667 = vmatmul.msk.f32.gmra.mxu3 %vm579_vm1, %v561_v31 }
  0x67   : > { %1622 = vmatmul.msk.f32.gmra.mxu0 %vm579_vm1, %v516_v32  ;;  %v529_v32 = vld [vmem:[%s2516_s0 + $0x98] sm:$0xff] }
  0x68   : > { %1642 = vmatmul.msk.f32.gmra.mxu1 %vm579_vm1, %v536_v33  ;;  %1652 = vmatmul.msk.f32.gmra.mxu2 %vm579_vm1, %v546_v34 }
  0x6a   : > { %1668 = vmatmul.msk.f32.gmra.mxu3 %vm579_vm1, %v562_v35 }
  0x6f   : > { %1623 = vmatmul.msk.f32.gmra.mxu0 %vm579_vm1, %v517_v36 }
  0x70   : > { %1643 = vmatmul.msk.f32.gmra.mxu1 %vm579_vm1, %v537_v37  ;;  %1653 = vmatmul.msk.f32.gmra.mxu2 %vm579_vm1, %v547_v38 }
  0x72   : > { %1669 = vmatmul.msk.f32.gmra.mxu3 %vm579_vm1, %v563_v39 }
  0x77   : > { %1624 = vmatmul.msk.f32.gmra.mxu0 %vm579_vm1, %v518_v40 }
  0x78   : > { %1644 = vmatmul.msk.f32.gmra.mxu1 %vm579_vm1, %v538_v41  ;;  %1654 = vmatmul.msk.f32.gmra.mxu2 %vm579_vm1, %v548_v42 }
  0x7a   : > { %1670 = vmatmul.msk.f32.gmra.mxu3 %vm579_vm1, %v564_v43 }
  0x7f   : > { %1625 = vmatmul.msk.f32.gmra.mxu0 %vm579_vm1, %v519_v44 }
  0x80   : > { %1645 = vmatmul.msk.f32.gmra.mxu1 %vm579_vm1, %v539_v45  ;;  %1655 = vmatmul.msk.f32.gmra.mxu2 %vm579_vm1, %v549_v46 }
  0x82   : > { %1671 = vmatmul.msk.f32.gmra.mxu3 %vm579_vm1, %v565_v47 }
  0x87   : > { %1626 = vmatmul.msk.f32.gmra.mxu0 %vm579_vm1, %v520_v48 }
  0x88   : > { %1656 = vmatmul.msk.f32.gmra.mxu2 %vm579_vm1, %v550_v49 }
  0x8a   : > { %1672 = vmatmul.msk.f32.gmra.mxu3 %vm579_vm1, %v566_v50 }
  0x8f   : > { %1627 = vmatmul.msk.f32.gmra.mxu0 %vm579_vm1, %v521_v51 }
  0x90   : > { %1657 = vmatmul.msk.f32.gmra.mxu2 %vm579_vm1, %v551_v52 }
  0x92   : > { %1673 = vmatmul.msk.f32.gmra.mxu3 %vm579_vm1, %v567_v53 }
  0x97   : > { %1628 = vmatmul.msk.f32.gmra.mxu0 %vm579_vm1, %v522_v54 }
  0x98   : > { %1658 = vmatmul.msk.f32.gmra.mxu2 %vm579_vm1, %v552_v55 }
  0x9a   : > { %1674 = vmatmul.msk.f32.gmra.mxu3 %vm579_vm1, %v568_v56 }
  0x9f   : > { %1629 = vmatmul.msk.f32.gmra.mxu0 %vm579_vm1, %v523_v57 }
  0xa0   : > { %1659 = vmatmul.msk.f32.gmra.mxu2 %vm579_vm1, %v553_v58 }
  0xa2   : > { %1675 = vmatmul.msk.f32.gmra.mxu3 %vm579_vm1, %v569_v59 }
  0xa7   : > { %1630 = vmatmul.msk.f32.gmra.mxu0 %vm579_vm1, %v524_v60 }
  0xa8   : > { %1660 = vmatmul.msk.f32.gmra.mxu2 %vm579_vm1, %v554_v61 }
  0xaa   : > { %1676 = vmatmul.msk.f32.gmra.mxu3 %vm579_vm1, %v570_v62 }
  0xaf   : > { %1631 = vmatmul.msk.f32.gmra.mxu0 %vm579_vm1, %v525_v63 }
  0xb0   : > { %1661 = vmatmul.msk.f32.gmra.mxu2 %vm579_vm1, %v555_v0 }
  0xb2   : > { %1677 = vmatmul.msk.f32.gmra.mxu3 %vm579_vm1, %v571_v1 }
  0xb4   : > { %v2222_v2 = vpop.f32.mrf.mxu0 }
  0xb5   : > { %v2227_v4 = vpop.f32.mrf.mxu1 }
  0xb7   : > { %1632 = vmatmul.msk.f32.gmra.mxu0 %vm579_vm1, %v526_v3 }
  0xba   : > { %1678 = vmatmul.msk.f32.gmra.mxu3 %vm579_vm1, %v572_v5 }
  0xbb   : > { %v883_v6 = vpop.f32.mrf.mxu2 }
  0xbc   : > { %v2234_v7 = vpop.f32.mrf.mxu0  ;;  %v884_v13 = vadd.f32 %v2244_v11, %v883_v6 }
  0xbd   : > { %v2239_v9 = vpop.f32.mrf.mxu1  ;;  %v931_v10 = vpop.f32.mrf.mxu3 }
  0xbe   : > { %v932_v14 = vadd.f32 %v2244_v11, %v931_v10  ;;  %v1015_v16 = vmax.f32 %v884_v13, 0.0 }
  0xbf   : > { %1633 = vmatmul.msk.f32.gmra.mxu0 %vm579_vm1, %v527_v8 }
  0xc0   : > { %v1031_v23 = vmax.f32 %v932_v14, 0.0  ;;  %v1079_v27 = vmin.f32 %v1015_v16, 6.0 }
  0xc2   : > { %1679 = vmatmul.msk.f32.gmra.mxu3 %vm579_vm1, %v573_v12  ;;  %v1095_v29 = vmin.f32 %v1031_v23, 6.0 }
  0xc3   : > { %v886_v15 = vpop.f32.mrf.mxu2 }
  0xc4   : > { %v887_v17 = vadd.f32 %v2244_v11, %v886_v15  ;;  %v2254_v18 = vpop.f32.mrf.mxu0 }
  0xc5   : > { %v2259_v20 = vpop.f32.mrf.mxu1  ;;  %v934_v21 = vpop.f32.mrf.mxu3 }
  0xc6   : > { %v1016_v22 = vmax.f32 %v887_v17, 0.0  ;;  %v935_v24 = vadd.f32 %v2244_v11, %v934_v21 }
  0xc7   : > { %1634 = vmatmul.msk.f32.gmra.mxu0 %vm579_vm1, %v528_v19  ;;  %v860_v19 = vadd.f32 %v2244_v11, %v2259_v20 }
  0xc8   : > { %v1080_v25 = vmin.f32 %v1016_v22, 6.0  ;;  %v1032_v26 = vmax.f32 %v935_v24, 0.0 }
  0xca   : > { %1144 = vmatpush.msrb.mxu2 %v1080_v25  ;;  %v1096_v28 = vmin.f32 %v1032_v26, 6.0  ;;  %v857_v25 = vadd.f32 %v2244_v11, %v2239_v9  ;;  %v1007_v26 = vmax.f32 %v860_v19, 0.0 }
  0xcb   : > { %v2263_v30 = vpop.f32.mrf.mxu2 }
  0xcc   : > { %1145 = vmatpush.msrb.mxu2 %v1079_v27  ;;  %v2265_v31 = vpop.f32.mrf.mxu0  ;;  %1164 = vmatpush.msrb.mxu3 %v1096_v28 }
  0xcd   : > { %v862_v33 = vpop.f32.mrf.mxu1  ;;  %v2270_v34 = vpop.f32.mrf.mxu3 }
  0xce   : > { %1165 = vmatpush.msrb.mxu3 %v1095_v29  ;;  %v863_v13 = vadd.f32 %v2244_v11, %v862_v33  ;;  %v854_v29 = vadd.f32 %v2244_v11, %v2227_v4 }
  0xcf   : > { %1635 = vmatmul.msk.f32.gmra.mxu0 %vm579_vm1, %v529_v32 }
  0xd0   : > { %v1008_v23 = vmax.f32 %v863_v13, 0.0 }
  0xd2   : > { %v1072_v20 = vmin.f32 %v1008_v23, 6.0 }
  0xd3   : > { %v2273_v35 = vpop.f32.mrf.mxu2 }
  0xd4   : > { %v2275_v36 = vpop.f32.mrf.mxu0 }
  0xd5   : > { %v865_v37 = vpop.f32.mrf.mxu1  ;;  %v2277_v38 = vpop.f32.mrf.mxu3 }
  0xd6   : > { %v866_v5 = vadd.f32 %v2244_v11, %v865_v37  ;;  %v1006_v37 = vmax.f32 %v857_v25, 0.0 }
  0xd8   : > { %v1009_v21 = vmax.f32 %v866_v5, 0.0  ;;  %v1070_v9 = vmin.f32 %v1006_v37, 6.0 }
  0xda   : > { %v1073_v27 = vmin.f32 %v1009_v21, 6.0 }
  0xdb   : > { %v2279_v39 = vpop.f32.mrf.mxu2 }
  0xdc   : > { %v2281_v40 = vpop.f32.mrf.mxu0 }
  0xdd   : > { %v868_v41 = vpop.f32.mrf.mxu1  ;;  %v2283_v42 = vpop.f32.mrf.mxu3 }
  0xde   : > { %v869_v0 = vadd.f32 %v2244_v11, %v868_v41  ;;  %v1071_v41 = vmin.f32 %v1007_v26, 6.0 }
  0xe0   : > { %v1010_v14 = vmax.f32 %v869_v0, 0.0 }
  0xe2   : > { %v1074_v24 = vmin.f32 %v1010_v14, 6.0 }
  0xe3   : > { %v2285_v43 = vpop.f32.mrf.mxu2 }
  0xe4   : > { %v2287_v44 = vpop.f32.mrf.mxu0 }
  0xe5   : > { %v871_v45 = vpop.f32.mrf.mxu1  ;;  %v2289_v46 = vpop.f32.mrf.mxu3 }
  0xe6   : > { %v872_v61 = vadd.f32 %v2244_v11, %v871_v45  ;;  %v1005_v45 = vmax.f32 %v854_v29, 0.0 }
  0xe8   : > { %v1011_v6 = vmax.f32 %v872_v61, 0.0 }
  0xea   : > { %v1075_v22 = vmin.f32 %v1011_v6, 6.0 }
  0xeb   : > { %v2291_v47 = vpop.f32.mrf.mxu2 }
  0xec   : > { %v2293_v48 = vpop.f32.mrf.mxu0 }
  0xed   : > { %v874_v49 = vpop.f32.mrf.mxu1  ;;  %v2295_v50 = vpop.f32.mrf.mxu3 }
  0xee   : > { %v875_v57 = vadd.f32 %v2244_v11, %v874_v49 }
  0xf0   : > { %v1012_v1 = vmax.f32 %v875_v57, 0.0 }
  0xf2   : > { %v1076_v16 = vmin.f32 %v1012_v1, 6.0 }
  0xf3   : > { %v2297_v51 = vpop.f32.mrf.mxu2 }
  0xf4   : > { %v2299_v52 = vpop.f32.mrf.mxu0 }
  0xf5   : > { %v877_v53 = vpop.f32.mrf.mxu1  ;;  %v2301_v54 = vpop.f32.mrf.mxu3 }
  0xf6   : > { %v878_v55 = vadd.f32 %v2244_v11, %v877_v53 }
  0xf8   : > { %v1013_v62 = vmax.f32 %v878_v55, 0.0  ;;  %v1069_v55 = vmin.f32 %v1005_v45, 6.0 }
  0xfa   : > { %v1077_v10 = vmin.f32 %v1013_v62, 6.0 }
  0xfb   : > { %v2304_v56 = vpop.f32.mrf.mxu2 }
  0xfc   : > { %v2307_v58 = vpop.f32.mrf.mxu0 }
  0xfd   : > { %v880_v59 = vpop.f32.mrf.mxu1  ;;  %v2309_v60 = vpop.f32.mrf.mxu3  ;;  %v821_v45 = vadd.f32 %v2244_v11, %v2307_v58  ;;  %v815_v58 = vadd.f32 %v2244_v11, %v2293_v48 }
  0xfe   : > { %v881_v63 = vadd.f32 %v2244_v11, %v880_v59 }
 0x100   : > { %v1014_v3 = vmax.f32 %v881_v63, 0.0 }
 0x102   : > { %v1078_v8 = vmin.f32 %v1014_v3, 6.0 }
 0x103   : > { %v2315_v12 = vpop.f32.mrf.mxu2 }
 0x104   : > { %1146 = vmatpush.msrb.mxu2 %v1078_v8  ;;  %v823_v15 = vpop.f32.mrf.mxu0 }
 0x105   : > { %v2318_v17 = vpop.f32.mrf.mxu3  ;;  %v824_v25 = vadd.f32 %v2244_v11, %v823_v15 }
 0x106   : > { %1147 = vmatpush.msrb.mxu2 %v1077_v10 }
 0x108   : > { %1148 = vmatpush.msrb.mxu2 %v1076_v16 }
 0x10a   : > { %1149 = vmatpush.msrb.mxu2 %v1075_v22 }
 0x10b   : > { %v2324_v28 = vpop.f32.mrf.mxu2 }
 0x10c   : > { %1150 = vmatpush.msrb.mxu2 %v1074_v24  ;;  %v826_v32 = vpop.f32.mrf.mxu0 }
 0x10d   : > { %v2328_v33 = vpop.f32.mrf.mxu3  ;;  %v827_v21 = vadd.f32 %v2244_v11, %v826_v32 }
 0x10e   : > { %1151 = vmatpush.msrb.mxu2 %v1073_v27 }
 0x110   : > { %1152 = vmatpush.msrb.mxu2 %v1072_v20 }
 0x112   : > { %1153 = vmatpush.msrb.mxu2 %v1071_v41 }
 0x113   : > { %v916_v49 = vpop.f32.mrf.mxu2 }
 0x114   : > { %1154 = vmatpush.msrb.mxu2 %v1070_v9  ;;  %v829_v53 = vpop.f32.mrf.mxu0  ;;  %v996_v9 = vmax.f32 %v827_v21, 0.0  ;;  %v911_v21 = vadd.f32 %v2244_v11, %v2315_v12 }
 0x115   : > { %v2330_v57 = vpop.f32.mrf.mxu3  ;;  %v830_v13 = vadd.f32 %v2244_v11, %v829_v53 }
 0x116   : > { %1155 = vmatpush.msrb.mxu2 %v1069_v55 }
 0x117   : > { %v997_v26 = vmax.f32 %v830_v13, 0.0  ;;  %v1060_v13 = vmin.f32 %v996_v9, 6.0 }
 0x11b   : > { %v919_v4 = vpop.f32.mrf.mxu2 }
 0x11c   : > { %v832_v59 = vpop.f32.mrf.mxu0  ;;  %v920_v55 = vadd.f32 %v2244_v11, %v919_v4  ;;  %v914_v4 = vadd.f32 %v2244_v11, %v2324_v28  ;;  %v992_v28 = vmax.f32 %v815_v58, 0.0 }
 0x11d   : > { %v2332_v61 = vpop.f32.mrf.mxu3  ;;  %v833_v6 = vadd.f32 %v2244_v11, %v832_v59 }
 0x11f   : > { %v998_v22 = vmax.f32 %v833_v6, 0.0 }
 0x121   : > { %v1062_v32 = vmin.f32 %v998_v22, 6.0 }
 0x123   : > { %v922_v62 = vpop.f32.mrf.mxu2 }
 0x124   : > { %v835_v63 = vpop.f32.mrf.mxu0  ;;  %v923_v24 = vadd.f32 %v2244_v11, %v922_v62  ;;  %v818_v62 = vadd.f32 %v2244_v11, %v2299_v52  ;;  %v812_v52 = vadd.f32 %v2244_v11, %v2287_v44  ;;  %v1113_v44 = vld [vmem:[%s2517_s1] sm:$0xff] }
 0x125   : > { %v2334_v0 = vpop.f32.mrf.mxu3  ;;  %v836_v1 = vadd.f32 %v2244_v11, %v835_v63  ;;  %v995_v63 = vmax.f32 %v824_v25, 0.0  ;;  %1115 = vst [vmem:[#allocation1] ss:$4 sm:$0xff] %v1113_v44 }
 0x126   : > { %v1028_v15 = vmax.f32 %v923_v24, 0.0 }
 0x127   : > { %v999_v14 = vmax.f32 %v836_v1, 0.0  ;;  %v1061_v1 = vmin.f32 %v997_v26, 6.0  ;;  %v908_v26 = vadd.f32 %v2244_v11, %v2304_v56 }
 0x129   : > { %v1063_v29 = vmin.f32 %v999_v14, 6.0  ;;  %v1027_v14 = vmax.f32 %v920_v55, 0.0  ;;  %v1056_v55 = vmin.f32 %v992_v28, 6.0 }
 0x12b   : > { %v925_v3 = vpop.f32.mrf.mxu2  ;;  %v1091_v12 = vmin.f32 %v1027_v14, 6.0 }
 0x12c   : > { %v838_v5 = vpop.f32.mrf.mxu0  ;;  %v926_v19 = vadd.f32 %v2244_v11, %v925_v3  ;;  %v917_v3 = vadd.f32 %v2244_v11, %v916_v49  ;;  %v1059_v49 = vmin.f32 %v995_v63, 6.0 }
 0x12d   : > { %v839_v8 = vadd.f32 %v2244_v11, %v838_v5  ;;  %v2339_v10 = vpop.f32.mrf.mxu3 }
 0x12e   : > { %v1029_v20 = vmax.f32 %v926_v19, 0.0  ;;  %v993_v19 = vmax.f32 %v818_v62, 0.0  ;;  %v1026_v22 = vmax.f32 %v917_v3, 0.0  ;;  %v800_v62 = vadd.f32 %v2244_v11, %v2254_v18 }
 0x12f   : > { %v1000_v16 = vmax.f32 %v839_v8, 0.0  ;;  %v994_v8 = vmax.f32 %v821_v45, 0.0  ;;  %v1024_v45 = vmax.f32 %v911_v21, 0.0  ;;  %v896_v18 = vadd.f32 %v2244_v11, %v2279_v39 }
 0x130   : > { %v1093_v6 = vmin.f32 %v1029_v20, 6.0  ;;  %v991_v20 = vmax.f32 %v812_v52, 0.0  ;;  %v1090_v9 = vmin.f32 %v1026_v22, 6.0  ;;  %v890_v39 = vadd.f32 %v2244_v11, %v2263_v30 }
 0x131   : > { %v1064_v23 = vmin.f32 %v1000_v16, 6.0  ;;  %v1092_v16 = vmin.f32 %v1028_v15, 6.0  ;;  %v1058_v24 = vmin.f32 %v994_v8, 6.0  ;;  %v902_v15 = vadd.f32 %v2244_v11, %v2291_v47 }
 0x132   : > { %v1019_v28 = vmax.f32 %v896_v18, 0.0 }
 0x133   : > { %v928_v27 = vpop.f32.mrf.mxu2  ;;  %1124 = vmatpush.msrb.mxu1 %v1064_v23  ;;  %v809_v23 = vadd.f32 %v2244_v11, %v2281_v40  ;;  %v1057_v40 = vmin.f32 %v993_v19, 6.0  ;;  %v893_v19 = vadd.f32 %v2244_v11, %v2273_v35 }
 0x134   : > { %v929_v37 = vadd.f32 %v2244_v11, %v928_v27  ;;  %v2347_v41 = vpop.f32.mrf.mxu0  ;;  %v1025_v27 = vmax.f32 %v914_v4, 0.0 }
 0x135   : > { %1125 = vmatpush.msrb.mxu1 %v1063_v29  ;;  %v2351_v53 = vpop.f32.mrf.mxu3  ;;  %v806_v29 = vadd.f32 %v2244_v11, %v2275_v36  ;;  %v990_v56 = vmax.f32 %v809_v23, 0.0  ;;  %v1018_v35 = vmax.f32 %v893_v19, 0.0 }
 0x136   : > { %v1030_v59 = vmax.f32 %v929_v37, 0.0  ;;  %v905_v37 = vadd.f32 %v2244_v11, %v2297_v51  ;;  %v1089_v36 = vmin.f32 %v1025_v27, 6.0  ;;  %v1055_v51 = vmin.f32 %v991_v20, 6.0 }
 0x137   : > { %1126 = vmatpush.msrb.mxu1 %v1062_v32  ;;  %v803_v32 = vadd.f32 %v2244_v11, %v2265_v31  ;;  %v989_v63 = vmax.f32 %v806_v29, 0.0  ;;  %v899_v31 = vadd.f32 %v2244_v11, %v2285_v43  ;;  %v1054_v58 = vmin.f32 %v990_v56, 6.0 }
 0x138   : > { %v1094_v5 = vmin.f32 %v1030_v59, 6.0  ;;  %v1023_v59 = vmax.f32 %v908_v26, 0.0  ;;  %v1022_v3 = vmax.f32 %v905_v37, 0.0  ;;  %v987_v43 = vmax.f32 %v800_v62, 0.0 }
 0x139   : > { %1127 = vmatpush.msrb.mxu1 %v1061_v1  ;;  %v797_v1 = vadd.f32 %v2244_v11, %v2234_v7  ;;  %v988_v47 = vmax.f32 %v803_v32, 0.0  ;;  %v794_v7 = vadd.f32 %v2244_v11, %v2222_v2  ;;  %v1082_v62 = vmin.f32 %v1018_v35, 6.0 }
 0x13a   : > { %1166 = vmatpush.msrb.mxu3 %v1094_v5  ;;  %v1088_v5 = vmin.f32 %v1024_v45, 6.0  ;;  %v1087_v4 = vmin.f32 %v1023_v59, 6.0  ;;  %v1086_v21 = vmin.f32 %v1022_v3, 6.0  ;;  %v1051_v27 = vmin.f32 %v987_v43, 6.0 }
 0x13b   : > { %1128 = vmatpush.msrb.mxu1 %v1060_v13  ;;  %v1021_v13 = vmax.f32 %v902_v15, 0.0  ;;  %v986_v52 = vmax.f32 %v797_v1, 0.0  ;;  %v1052_v22 = vmin.f32 %v988_v47, 6.0  ;;  %v985_v26 = vmax.f32 %v794_v7, 0.0 }
 0x13c   : > { %1167 = vmatpush.msrb.mxu3 %v1093_v6  ;;  %v2365_v48 = vpop.f32.mrf.mxu0  ;;  %v1117_v7 = vld.sshfl [vmem:[#allocation1 + $0x8] sm:$0xff pattern:$0x73625140]  ;;  %v959_v43 = vadd.f32 %v2244_v11, %v2318_v17  ;;  %v950_v17 = vadd.f32 %v2244_v11, %v2295_v50  ;;  %v938_v35 = vadd.f32 %v2244_v11, %v2270_v34  ;;  %v1206_v34 = vld [vmem:[%s2520_s4 + $0x10] sm:$0xff] }
 0x13d   : > { %1129 = vmatpush.msrb.mxu1 %v1059_v49  ;;  %v979_v25 = vpop.f32.mrf.mxu3  ;;  %v1020_v49 = vmax.f32 %v899_v31, 0.0  ;;  %v1085_v44 = vmin.f32 %v1021_v13, 6.0  ;;  %v1050_v30 = vmin.f32 %v986_v52, 6.0  ;;  %v845_v37 = vadd.f32 %v2244_v11, %v2365_v48 }
 0x13e   : > { %1168 = vmatpush.msrb.mxu3 %v1092_v16  ;;  %v1053_v16 = vmin.f32 %v989_v63, 6.0  ;;  %v980_v2 = vadd.f32 %v2244_v11, %v979_v25  ;;  %v1049_v15 = vmin.f32 %v985_v26, 6.0  ;;  %v971_v48 = vadd.f32 %v2244_v11, %v2334_v0  ;;  %v1116_v63 = vld.sshfl [vmem:[#allocation1] sm:$0xff pattern:$0x73625140] }
 0x13f   : > { %1130 = vmatpush.msrb.mxu1 %v1058_v24  ;;  %v1084_v29 = vmin.f32 %v1020_v49, 6.0  ;;  %v968_v31 = vadd.f32 %v2244_v11, %v2332_v61  ;;  %v965_v0 = vadd.f32 %v2244_v11, %v2330_v57  ;;  %v962_v61 = vadd.f32 %v2244_v11, %v2328_v33 }
 0x140   : > { %1169 = vmatpush.msrb.mxu3 %v1091_v12  ;;  %v977_v12 = vadd.f32 %v2244_v11, %v2351_v53  ;;  %v1047_v32 = vmax.f32 %v980_v2, 0.0  ;;  %v842_v53 = vadd.f32 %v2244_v11, %v2347_v41  ;;  %v956_v52 = vadd.f32 %v2244_v11, %v2309_v60 }
 0x141   : > { %1131 = vmatpush.msrb.mxu1 %v1057_v40  ;;  %v1017_v40 = vmax.f32 %v890_v39, 0.0  ;;  %v1043_v13 = vmax.f32 %v968_v31, 0.0  ;;  %v1042_v57 = vmax.f32 %v965_v0, 0.0  ;;  %v1041_v19 = vmax.f32 %v962_v61, 0.0 }
 0x142   : > { %1170 = vmatpush.msrb.mxu3 %v1090_v9  ;;  %v974_v9 = vadd.f32 %v2244_v11, %v2339_v10  ;;  %v1001_v47 = vmax.f32 %v842_v53, 0.0  ;;  %v953_v33 = vadd.f32 %v2244_v11, %v2301_v54  ;;  %v941_v26 = vadd.f32 %v2244_v11, %v2277_v38  ;;  %v1119_v38 = vld.sshfl [vmem:[#allocation1 + $0x18] sm:$0xff pattern:$0x73625140] }
 0x143   : > { %1132 = vmatpush.msrb.mxu1 %v1056_v55  ;;  %v1083_v55 = vmin.f32 %v1019_v28, 6.0  ;;  %v1081_v41 = vmin.f32 %v1017_v40, 6.0  ;;  %v1107_v49 = vmin.f32 %v1043_v13, 6.0  ;;  %v1106_v39 = vmin.f32 %v1042_v57, 6.0 }
 0x144   : > { %1171 = vmatpush.msrb.mxu3 %v1089_v36  ;;  %v847_v6 = vpop.f32.mrf.mxu0  ;;  %v1046_v36 = vmax.f32 %v977_v12, 0.0  ;;  %v1045_v3 = vmax.f32 %v974_v9, 0.0  ;;  %v947_v28 = vadd.f32 %v2244_v11, %v2289_v46  ;;  %v1038_v60 = vmax.f32 %v953_v33, 0.0 }
 0x145   : > { %1133 = vmatpush.msrb.mxu1 %v1055_v51  ;;  %v982_v8 = vpop.f32.mrf.mxu3  ;;  %v848_v23 = vadd.f32 %v2244_v11, %v847_v6  ;;  %v1002_v51 = vmax.f32 %v845_v37, 0.0  ;;  %v1118_v6 = vld.sshfl [vmem:[#allocation1 + $0x10] sm:$0xff pattern:$0x73625140] }
 0x146   : > { %1172 = vmatpush.msrb.mxu3 %v1088_v5  ;;  %v983_v14 = vadd.f32 %v2244_v11, %v982_v8  ;;  %v1111_v5 = vmin.f32 %v1047_v32, 6.0  ;;  %v1110_v8 = vmin.f32 %v1046_v36, 6.0  ;;  %v1102_v50 = vmin.f32 %v1038_v60, 6.0  ;;  %v1758_v36 = vld [vmem:[%s2521_s5] ss:$0 sm:$0xff] }
 0x147   : > { %1134 = vmatpush.msrb.mxu1 %v1054_v58  ;;  %v1003_v25 = vmax.f32 %v848_v23, 0.0  ;;  %v1044_v58 = vmax.f32 %v971_v48, 0.0  ;;  %v1066_v18 = vmin.f32 %v1002_v51, 6.0  ;;  %v1105_v23 = vmin.f32 %v1041_v19, 6.0 }
 0x148   : > { %1173 = vmatpush.msrb.mxu3 %v1087_v4  ;;  %v1048_v24 = vmax.f32 %v983_v14, 0.0  ;;  %v1109_v4 = vmin.f32 %v1045_v3, 6.0  ;;  %v1065_v14 = vmin.f32 %v1001_v47, 6.0  ;;  %v1246_v48 = vlaneseq }
 0x149   : > { %1135 = vmatpush.msrb.mxu1 %v1053_v16  ;;  %v1067_v1 = vmin.f32 %v1003_v25, 6.0  ;;  %v1108_v16 = vmin.f32 %v1044_v58, 6.0  ;;  %v1205_v25 = vld [vmem:[%s2520_s4 + $0x8] sm:$0xff] }
 0x14a   : > { %1174 = vmatpush.msrb.mxu3 %v1086_v21  ;;  %v1112_v56 = vmin.f32 %v1048_v24, 6.0  ;;  %v1040_v21 = vmax.f32 %v959_v43, 0.0  ;;  %v944_v24 = vadd.f32 %v2244_v11, %v2283_v42 }
 0x14b   : > { %1136 = vmatpush.msrb.mxu1 %v1052_v22  ;;  %v1039_v22 = vmax.f32 %v956_v52, 0.0 }
 0x14c   : > { %1175 = vmatpush.msrb.mxu3 %v1085_v44  ;;  %v850_v20 = vpop.f32.mrf.mxu0  ;;  %v1104_v2 = vmin.f32 %v1040_v21, 6.0  ;;  %v1037_v44 = vmax.f32 %v950_v17, 0.0  ;;  %v1035_v12 = vmax.f32 %v944_v24, 0.0 }
 0x14d   : > { %1137 = vmatpush.msrb.mxu1 %v1051_v27  ;;  %v851_v45 = vadd.f32 %v2244_v11, %v850_v20  ;;  %v1103_v54 = vmin.f32 %v1039_v22, 6.0  ;;  %v1036_v27 = vmax.f32 %v947_v28, 0.0  ;;  %v1033_v20 = vmax.f32 %v938_v35, 0.0  ;;  %v1207_v11 = vld [vmem:[%s2520_s4 + $0x18] sm:$0xff] }
 0x14e   : > { %1176 = vmatpush.msrb.mxu3 %v1084_v29  ;;  %v1101_v46 = vmin.f32 %v1037_v44, 6.0  ;;  %v1034_v29 = vmax.f32 %v941_v26, 0.0  ;;  %v1099_v42 = vmin.f32 %v1035_v12, 6.0 }
 0x14f   : > { %1138 = vmatpush.msrb.mxu1 %v1050_v30  ;;  %v1004_v59 = vmax.f32 %v851_v45, 0.0  ;;  %v1100_v30 = vmin.f32 %v1036_v27, 6.0  ;;  %v1097_v37 = vmin.f32 %v1033_v20, 6.0  ;;  %v1204_v45 = vld [vmem:[%s2520_s4] sm:$0xff] }
 0x150   : > { %1177 = vmatpush.msrb.mxu3 %v1083_v55  ;;  %v1098_v40 = vmin.f32 %v1034_v29, 6.0 }
 0x151   : > { %1139 = vmatpush.msrb.mxu1 %v1049_v15  ;;  %v1068_v10 = vmin.f32 %v1004_v59, 6.0 }
 0x152   : > { %1178 = vmatpush.msrb.mxu3 %v1082_v62  ;;  %1140 = vmatmul.f32.vlgmr.msrb.gmra.mxu1 %v1116_v63  ;;  %v1759_v62 = vld [vmem:[%s2522_s6] ss:$0 sm:$0xff]  ;;  %v1247_v63 = vand.u32 127, %v1246_v48 }
 0x153   : > { %1184 = vmatpush.msra.mxu1 %v1112_v56  ;;  %1156 = vmatpush.msrb.mxu2 %v1068_v10 }
 0x154   : > { %1179 = vmatpush.msrb.mxu3 %v1081_v41  ;;  %vm1249_vm3 = vcmp.ge.s32.totalorder %v1247_v63, 50  ;;  %vm1250_vm4 = vcmp.lt.s32.totalorder %v1247_v63, 53  ;;  %vm1269_vm7 = vcmp.ge.s32.totalorder %v1247_v63, 54  ;;  %vm1270_vm8 = vcmp.lt.s32.totalorder %v1247_v63, 57 }
 0x155   : > { %1185 = vmatpush.msra.mxu1 %v1111_v5  ;;  %1157 = vmatpush.msrb.mxu2 %v1067_v1  ;;  %v1760_v1 = vld [vmem:[%s2523_s7] ss:$0 sm:$0xff]  ;;  %vm1251_vm5 = vmand %vm1249_vm3, %vm1250_vm4 }
 0x156   : > { %1180 = vmatmul.f32.vlgmr.msrb.gmra.mxu3 %v1118_v6  ;;  %vm1271_vm9 = vmand %vm1269_vm7, %vm1270_vm8 }
 0x157   : > { %1186 = vmatpush.msra.mxu1 %v1110_v8  ;;  %1158 = vmatpush.msrb.mxu2 %v1066_v18 }
 0x159   : > { %1187 = vmatpush.msra.mxu1 %v1109_v4  ;;  %1159 = vmatpush.msrb.mxu2 %v1065_v14 }
 0x15a   : > { %1160 = vmatmul.f32.vlgmr.msrb.gmra.mxu2 %v1117_v7 }
 0x15b   : > { %1188 = vmatpush.msra.mxu1 %v1108_v16  ;;  %1228 = vmatpush.msra.mxu2 %v1207_v11 }
 0x15d   : > { %1189 = vmatpush.msra.mxu1 %v1107_v49  ;;  %1229 = vmatpush.msra.mxu2 %v1206_v34 }
 0x15f   : > { %1190 = vmatpush.msra.mxu1 %v1106_v39  ;;  %1230 = vmatpush.msra.mxu2 %v1205_v25 }
 0x161   : > { %1191 = vmatpush.msra.mxu1 %v1105_v23  ;;  %1231 = vmatpush.msra.mxu2 %v1204_v45  ;;  %v1761_v23 = vld [vmem:[%s2524_s8] ss:$0 sm:$0xff] }
 0x163   : > { %1192 = vmatpush.msra.mxu1 %v1104_v2 }
 0x165   : > { %1193 = vmatpush.msra.mxu1 %v1103_v54 }
 0x167   : > { %1194 = vmatpush.msra.mxu1 %v1102_v50 }
 0x169   : > { %1195 = vmatpush.msra.mxu1 %v1101_v46 }
 0x16b   : > { %1196 = vmatpush.msra.mxu1 %v1100_v30 }
 0x16d   : > { %1197 = vmatpush.msra.mxu1 %v1099_v42 }
 0x16f   : > { %1198 = vmatpush.msra.mxu1 %v1098_v40 }
 0x171   : > { %1199 = vmatpush.msra.mxu1 %v1097_v37 }
 0x172   : > { %1200 = vmatmul.f32.vlgmr.msra.gmra.mxu1 %v1119_v38 }
 0x1cf   : > { %v1141_v9 = vpop.f32.mrf.mxu1 }
 0x1d9   : > { %v1181_v55 = vpop.f32.mrf.mxu3 }
 0x1dd   : > { %v1161_v32 = vpop.f32.mrf.mxu2 }
 0x1de   : > { %v1162_v56 = vadd.f32 %v1161_v32, %v1141_v9 }
 0x1e0   : > { %v1182_v53 = vadd.f32 %v1181_v55, %v1162_v56 }
 0x1ef   : > { %v1201_v15 = vpop.f32.mrf.mxu1 }
 0x1f0   : > { %v1202_v59 = vadd.f32 %v1201_v15, %v1182_v53 }
 0x1f2   : > { %1680 = vmatmul.msk.f32.vlgmr.msra.gmra.mxu2 %vm1212_vm2, %v1202_v59 }
 0x275   : > { %v1233_v51 = vpop.f32.mrf.mxu2 }
 0x276   : > { %v1234_v10 = vadd.f32 %v1758_v36, %v1233_v51 }
 0x278   : > { %v1240_v31 = vmul.f32 %v1759_v62, %v1234_v10 }
 0x27a   : > { %v1245_v3 = vadd.f32 %v1760_v1, %v1240_v31 }
 0x27c   : > { %v1248_v5 = vmul.f32 %v1245_v3, %v1245_v3  ;;  %v1296_v44 = vmul.f32 %v1761_v23, %v1245_v3 }
 0x27e   : > { %v1252_v41 = vsel %vm1251_vm5, %v1248_v5, 0.0  ;;  %v1272_v47 = vsel %vm1271_vm9, %v1248_v5, 0.0 }
 0x27f   : > { %v1254_v6 = vsel %vm1253_vm6, %v1252_v41, 0.0  ;;  %v1273_v0 = vsel %vm1253_vm6, %v1272_v47, 0.0 }
 0x280   : > { %1255 = vadd.xlane.f32.xlu0 %v1254_v6 }
 0x288   : > { %1274 = vadd.xlane.f32.xlu0 %v1273_v0 }
 0x2f3   : > { %v1256_v58 = vpop.xlane.xlu0 %1255 }
 0x2f4   : > { %1762 = vrsqrt.f32 %v1256_v58  ;;  %vm1264_vm10 = vcmp.eq.f32.partialorder %v1256_v58, inf  ;;  %v1267_v17 = vand.u32 2147483648, %v1256_v58  ;;  %vm1266_vm12 = vcmp.eq.f32.partialorder %v1256_v58, 0.0 }
 0x2fa   : > { %v1763_v8 = vpop.eup %1762 }
 0x2fb   : > { %v1258_v18 = vmul.f32 %v1763_v8, %v1256_v58  ;;  %v1275_v61 = vpop.xlane.xlu0 %1274 }
 0x2fc   : > { %1764 = vrsqrt.f32 %v1275_v61  ;;  %vm1283_vm11 = vcmp.eq.f32.partialorder %v1275_v61, inf  ;;  %v1286_v22 = vand.u32 2147483648, %v1275_v61  ;;  %vm1285_vm13 = vcmp.eq.f32.partialorder %v1275_v61, 0.0 }
 0x2fd   : > { %v1259_v13 = vmul.f32 %v1763_v8, %v1258_v18 }
 0x2ff   : > { %v1260_v4 = vmul.f32 0.5, %v1259_v13 }
 0x301   : > { %v1261_v14 = vsub.f32 1.5, %v1260_v4 }
 0x302   : > { %v1765_v7 = vpop.eup %1764 }
 0x303   : > { %v1277_v43 = vmul.f32 %v1765_v7, %v1275_v61  ;;  %v1262_v57 = vmul.f32 %v1763_v8, %v1261_v14 }
 0x305   : > { %v1278_v16 = vmul.f32 %v1765_v7, %v1277_v43  ;;  %v1263_v19 = vmul.f32 %v1262_v57, %v1256_v58 }
 0x307   : > { %v1279_v52 = vmul.f32 0.5, %v1278_v16  ;;  %v1265_v21 = vsel %vm1264_vm10, %v1256_v58, %v1263_v19 }
 0x308   : > { %v1268_v60 = vsel %vm1266_vm12, %v1267_v17, %v1265_v21 }
 0x309   : > { %v1280_v49 = vsub.f32 1.5, %v1279_v52 }
 0x30b   : > { %v1281_v33 = vmul.f32 %v1765_v7, %v1280_v49 }
 0x30d   : > { %v1282_v39 = vmul.f32 %v1281_v33, %v1275_v61 }
 0x30f   : > { %v1284_v28 = vsel %vm1283_vm11, %v1275_v61, %v1282_v39 }
 0x310   : > { %v1287_v2 = vsel %vm1285_vm13, %v1286_v22, %v1284_v28 }
 0x311   : > { %v1288_v24 = vadd.f32 %v1287_v2, %v1268_v60 }
 0x313   : > { %v1289_v54 = vmul.f32 0.5, %v1288_v24 }
 0x315   : > { %1291 = vst.msk [vmem:[#allocation3] sm:$0x3] %vm1290_vm14, %v1289_v54  ;;  %v1297_v26 = vmul.f32 %v1296_v44, %v1289_v54 }
 0x317   : > { %1299 = vst.msk [vmem:[#allocation2] sm:$0x3] %vm1298_vm15, %v1297_v26 }
 0x318 PF: > { %v1306_v27 = vld [vmem:[%s1982_s23 + $0x30] sm:$0x55]  ;;  %vm1393_vm0 = vcmask 1041408   ;;  %v1305_v50 = vld [vmem:[%s1982_s23 + $0x28] sm:$0xff]  ;;  %v1304_v35 = vld [vmem:[%s1982_s23 + $0x20] sm:$0xff]  ;;  %vm1389_vm1 = vcmask 408576  }
 0x319   : > { %v1333_v12 = vunpack.c.2.s8 %v1306_v27  ;;  %v1334_v46 = vunpack.c.3.s8 %v1306_v27  ;;  %v1329_v29 = vunpack.c.2.s8 %v1305_v50  ;;  %v1330_v30 = vunpack.c.3.s8 %v1305_v50  ;;  %v1303_v38 = vld [vmem:[%s1982_s23 + $0x18] sm:$0xff]  ;;  %v1302_v9 = vld [vmem:[%s1982_s23 + $0x10] sm:$0xff]  ;;  %v1301_v1 = vld [vmem:[%s1982_s23 + $0x8] sm:$0xff]  ;;  %s1695_s13 = sshll.u32 %s1837_s20, 3  ;;  %s1516_s20 = sshll.u32 %s1984_s24, 4  ;;  %s1517_s20 = int_to_ptr.vmem [resolvable:$true] %s1516_s20 }
 0x31a   : > { %v1332_v20 = vunpack.c.1.s8 %v1306_v27  ;;  %v1325_v42 = vunpack.c.2.s8 %v1304_v35  ;;  %v1326_v40 = vunpack.c.3.s8 %v1304_v35  ;;  %v1331_v37 = vunpack.c.0.s8 %v1306_v27  ;;  %v1300_v6 = vld [vmem:[%s1982_s23] sm:$0xff]  ;;  %s1514_s9 = scalar_lea.hbm %s2527_s11, %s1695_s13  ;;  %s1501_s19 = scalar_lea.sflag [#allocation6], %s1971_s26 }
 0x31b   : > { %v1361_v11 = vcvt.s32.f32 %v1333_v12  ;;  %v1362_v34 = vcvt.s32.f32 %v1334_v46  ;;  %v1357_v25 = vcvt.s32.f32 %v1329_v29  ;;  %v1358_v45 = vcvt.s32.f32 %v1330_v30  ;;  %s1518_s25 = sshll.u32 %s1514_s9, 4  ;;  %s1787_s23 = scalar_lea.hbm %s2527_s11, 48  ;;  %s1519_s25 = int_to_ptr.hbm [resolvable:$true] %s1518_s25 }
 0x31c   : > { %v1360_v32 = vcvt.s32.f32 %v1332_v20  ;;  %v1353_v56 = vcvt.s32.f32 %v1325_v42  ;;  %v1354_v55 = vcvt.s32.f32 %v1326_v40  ;;  %v1359_v53 = vcvt.s32.f32 %v1331_v37  ;;  %s1781_s21 = sshra.s32 %s1519_s25, 4  ;;  %s1782_s21 = int_to_ptr.hbm [resolvable:$true] %s1781_s21 }
 0x31d   : > { %1685 = vmatpush.msk.msra.mxu2 %vm1393_vm0, %v1361_v11  ;;  %1687 = vmatpush.msk.msra.mxu3 %vm1393_vm0, %v1362_v34  ;;  %v1328_v15 = vunpack.c.1.s8 %v1305_v50  ;;  %v1321_v59 = vunpack.c.2.s8 %v1303_v38  ;;  %v1322_v48 = vunpack.c.3.s8 %v1303_v38  ;;  %v1327_v36 = vunpack.c.0.s8 %v1305_v50  ;;  %v1364_v50 = vld [vmem:[#allocation3] sm:$0x3]  ;;  %s1783_s29 = scalar_lea.hbm %s1782_s21, 8  ;;  %p1788_p6 = scmp.lt.s32.totalorder %s1782_s21, %s2527_s11 }
 0x31e   : > { %1683 = vmatpush.msk.msra.mxu1 %vm1393_vm0, %v1360_v32  ;;  %1681 = vmatpush.msk.msra.mxu0 %vm1393_vm0, %v1359_v53  ;;  %v1324_v62 = vunpack.c.1.s8 %v1304_v35  ;;  %v1317_v63 = vunpack.c.2.s8 %v1302_v9  ;;  %v1318_v51 = vunpack.c.3.s8 %v1302_v9  ;;  %v1323_v10 = vunpack.c.0.s8 %v1304_v35  ;;  %v1363_v2 = vld [vmem:[#allocation2] sm:$0x3]  ;;  %v1365_v35 = vld [vmem:[%s499_s16] sm:$0xf]  ;;  %p1784_p2 = scmp.ne.s32.totalorder %s1782_s21, %s1783_s29  ;;  %p1789_p7 = scmp.lt.s32.totalorder %s1787_s23, %s1783_s29 }
 0x31f   : > { %1456 = vmatpush.msra.mxu2 %v1357_v25  ;;  %1476 = vmatpush.msra.mxu3 %v1358_v45  ;;  %v1356_v31 = vcvt.s32.f32 %v1328_v15  ;;  %v1349_v3 = vcvt.s32.f32 %v1321_v59  ;;  %v1350_v5 = vcvt.s32.f32 %v1322_v48  ;;  %v1355_v41 = vcvt.s32.f32 %v1327_v36 }
 0x320   : > { %v1352_v47 = vcvt.s32.f32 %v1324_v62  ;;  %v1345_v0 = vcvt.s32.f32 %v1317_v63  ;;  %v1346_v58 = vcvt.s32.f32 %v1318_v51  ;;  %v1351_v8 = vcvt.s32.f32 %v1323_v10  ;;  %p1785_p3 = pnand %p1784_p2, %p1947_p5  ;;  %p1790_p8 = por %p1789_p7, %p1788_p6 }
 0x321   : > { %1457 = vmatpush.msra.mxu2 %v1353_v56  ;;  %1477 = vmatpush.msra.mxu3 %v1354_v55  ;;  %v1320_v18 = vunpack.c.1.s8 %v1303_v38  ;;  %v1313_v61 = vunpack.c.2.s8 %v1301_v1  ;;  %v1314_v13 = vunpack.c.3.s8 %v1301_v1  ;;  %v1319_v4 = vunpack.c.0.s8 %v1303_v38 }
 0x322   : > { %1436 = vmatpush.msra.mxu1 %v1356_v31  ;;  %1416 = vmatpush.msra.mxu0 %v1355_v41  ;;  %v1316_v14 = vunpack.c.1.s8 %v1302_v9  ;;  %v1309_v7 = vunpack.c.2.s8 %v1300_v6  ;;  %v1310_v43 = vunpack.c.3.s8 %v1300_v6  ;;  %v1315_v57 = vunpack.c.0.s8 %v1302_v9  ;;  %p1786_p4 = pneg %p1785_p3 }
 0x323   : > { %1458 = vmatpush.msra.mxu2 %v1349_v3  ;;  %1478 = vmatpush.msra.mxu3 %v1350_v5  ;;  %v1348_v16 = vcvt.s32.f32 %v1320_v18  ;;  %v1341_v52 = vcvt.s32.f32 %v1313_v61  ;;  %v1342_v19 = vcvt.s32.f32 %v1314_v13  ;;  %v1347_v49 = vcvt.s32.f32 %v1319_v4 }
 0x324   : > { %1437 = vmatpush.msra.mxu1 %v1352_v47  ;;  %1417 = vmatpush.msra.mxu0 %v1351_v8  ;;  %v1344_v33 = vcvt.s32.f32 %v1316_v14  ;;  %v1337_v21 = vcvt.s32.f32 %v1309_v7  ;;  %v1338_v39 = vcvt.s32.f32 %v1310_v43  ;;  %v1343_v17 = vcvt.s32.f32 %v1315_v57  ;;  %p1791_p10 = pnand %p1790_p8, %p1786_p4 }
 0x325   : > { %1459 = vmatpush.msra.mxu2 %v1345_v0  ;;  %1479 = vmatpush.msra.mxu3 %v1346_v58  ;;  %v1312_v22 = vunpack.c.1.s8 %v1301_v1  ;;  %v1311_v23 = vunpack.c.0.s8 %v1301_v1  ;;  %v1308_v28 = vunpack.c.1.s8 %v1300_v6  ;;  %v1307_v60 = vunpack.c.0.s8 %v1300_v6 }
 0x326   : > { %1438 = vmatpush.msra.mxu1 %v1348_v16  ;;  %1418 = vmatpush.msra.mxu0 %v1347_v49  ;;  %v1847_v27 = vmov 0   ;;  %v1366_v12 = vunpack.c.l.bf16 %v1365_v35  ;;  %vm1494_vm2 = vcmask 1045508   ;;  %vm1496_vm3 = vcmask 1043456  }
 0x327   : > { %1460 = vmatpush.msra.mxu2 %v1341_v52  ;;  %1480 = vmatpush.msra.mxu3 %v1342_v19  ;;  %v1340_v24 = vcvt.s32.f32 %v1312_v22  ;;  %v1339_v44 = vcvt.s32.f32 %v1311_v23  ;;  %v1336_v54 = vcvt.s32.f32 %v1308_v28  ;;  %v1335_v26 = vcvt.s32.f32 %v1307_v60 }
 0x328   : > { %1439 = vmatpush.msra.mxu1 %v1344_v33  ;;  %1419 = vmatpush.msra.mxu0 %v1343_v17  ;;  %v1374_v46 = vperm.slane %v1366_v12, 2  ;;  %v1373_v29 = vperm.slane %v1366_v12, 0  ;;  %v1375_v30 = vperm.slane %v1366_v12, 4  ;;  %v1376_v20 = vperm.slane %v1366_v12, 6 }
 0x329   : > { %1461 = vmatpush.msra.mxu2 %v1337_v21  ;;  %1481 = vmatpush.msra.mxu3 %v1338_v39 }
 0x32a   : > { %1686 = vmatmul.msk.f32.vlgmr.msra.gmra.mxu2 %vm1389_vm1, %v1363_v2  ;;  %1688 = vmatmul.msk.f32.vlgmr.msra.gmra.mxu3 %vm1389_vm1, %v1363_v2  ;;  %v1382_v42 = vperm.slane %v1374_v46, 0  ;;  %v1381_v37 = vperm.slane %v1373_v29, 0  ;;  %v1383_v38 = vperm.slane %v1375_v30, 0  ;;  %v1384_v11 = vperm.slane %v1376_v20, 0 }
 0x32b   : > { %1440 = vmatpush.msra.mxu1 %v1340_v24  ;;  %1420 = vmatpush.msra.mxu0 %v1339_v44 }
 0x32c   : > { %1766 = vset.pattern.permute.xlu0 %v1847_v27 }
 0x32d   : > { %1441 = vmatpush.msra.mxu1 %v1336_v54  ;;  %1421 = vmatpush.msra.mxu0 %v1335_v26 }
 0x32e   : > { %1684 = vmatmul.msk.f32.vlgmr.msra.gmra.mxu1 %vm1389_vm1, %v1363_v2  ;;  %1682 = vmatmul.msk.f32.vlgmr.msra.gmra.mxu0 %vm1389_vm1, %v1363_v2 }
 0x32f   : > { %1369 = vperm.xlu0 %1766, %v1364_v50  }
 0x3a1   : > { %v1370_v40 = vpop.permute.xlu0 %1369 }
 0x3a2   : > { %v1386_v34 = vmul.f32 %v1382_v42, %v1370_v40  ;;  %v1385_v25 = vmul.f32 %v1381_v37, %v1370_v40  ;;  %v1387_v45 = vmul.f32 %v1383_v38, %v1370_v40  ;;  %v1388_v9 = vmul.f32 %v1384_v11, %v1370_v40 }
 0x3ab   : > { %v1443_v32 = vpop.f32.mrf.mxu1  ;;  %v1423_v56 = vpop.f32.mrf.mxu0 }
 0x3ac   : > { %v1444_v55 = vadd.f32 %v1443_v32, %v1386_v34  ;;  %v1424_v48 = vadd.f32 %v1423_v56, %v1385_v25 }
 0x3ad   : > { %v1463_v53 = vpop.f32.mrf.mxu2  ;;  %v1483_v15 = vpop.f32.mrf.mxu3 }
 0x3ae   : > { %v1490_v59 = vrot.slane %v1444_v55, 6  ;;  %v1464_v36 = vadd.f32 %v1463_v53, %v1387_v45  ;;  %v1484_v62 = vadd.f32 %v1483_v15, %v1388_v9 }
 0x3b0   : > { %v1491_v63 = vrot.slane %v1464_v36, 4  ;;  %v1492_v51 = vrot.slane %v1484_v62, 2  ;;  %v1493_v10 = vsel %vm1393_vm0, %v1424_v48, %v1490_v59 }
 0x3b2   : > { %v1495_v1 = vsel %vm1494_vm2, %v1491_v63, %v1492_v51 }
 0x3b3   : > { %v1497_v31 = vsel %vm1496_vm3, %v1493_v10, %v1495_v1 }
 0x3b4   : > { %1499 = vst [vmem:[%s1984_s24] sm:$0xff] %v1497_v31 }
 0x3b5   : > { %1794 = shalt.err (!%p1791_p10)
}
 0x3b6   : > { %1701 = dma.vmem_to_hbm [thread:$0]  (%p1947_p5), %s1517_s20, 128, %s1519_s25, %s1501_s19  }
 0x3b7 PF: > { %p1707_p11 = scmp.ge.s32.totalorder %s1845_s22, 2  ;;  %s1530_s26 = sand.u32 1, %s1825_s17  }
 0x3b8   : > { %s1531_s24 = scalar_lea.sflag [#allocation6], %s1530_s26 }
 0x3b9   : > { %p1704_p12 = pnand %p1707_p11, %p1958_p9 }
 0x3bb   : > { %p1705_p13 = pneg %p1704_p12 }
 0x3bd   : > { %1820 = dma.done.wait (%p1705_p13), %s1531_s24, 128  }
 0x3be   : > { %1822 = vsyncadd (%p1705_p13), %s1531_s24, 4294967168  ;;  %s24_s22 = sadd.s32 1, %s1845_s22   ;;  %s2539_s28 = sld [smem:[#allocation8_spill]] }
 0x3bf   : > { %p21_p0 = scmp.ge.s32.totalorder %s24_s22, 8   ;;  %s2540_s19 = sld [smem:[#allocation11_spill]] }
 0x3c0   : > { %s2541_s20 = sld [smem:[#allocation9_spill]]  ;;  %s2543_s17 = smov %s1829_s18 }
 0x3c1   : > { %s2542_s21 = sld [smem:[#allocation10_spill]]  ;;  %23 = sbr.rel (!%p21_p0) target bundleno = 6 (0x6), region = 149 }
 0x3c4   : > { %s2544_s18 = smov %s2539_s28 }
 0x3c6   :  { %1537 = vsyncpa [#allocation6], 1 }
 0x3c7   :  { %1539 = vsyncpa [#allocation6 + $0x1], 1 }

</bundles_post_ra>
